<compile_context>
chip_gen: v7x
topology: tpu7x:2x2x1
jax: 0.10.0
libtpu: 0.0.40
codegen_flags: <defaults>
</compile_context>

<pallas_src>
import functools

import jax
import jax.numpy as jnp
from jax import lax
from jax.experimental import pallas as pl
from jax.experimental.pallas import tpu as pltpu

BN_EPS = 1e-5
LANE = 128


def _round_up(x, m):
    return (x + m - 1) // m * m


# ---------------------------------------------------------------------------
# Phase 1: Conv2d (in-kernel im2col) + bias + ReLU + time-emb add
#          + per-sample BatchNorm partial statistics.
# Grid: (N,) -- one padded NHWC sample per step ("parallel").
# TODO(synk): for very large H*W additionally tile OH with halo blocks /
# manual DMA; one-sample-per-step tiles are sufficient at these shapes.
# ---------------------------------------------------------------------------
def _conv_stats_kernel(x_ref, w_ref, te_ref, wt_ref, bias_ref,
                       y_ref, stats_ref, *, KH, KW, OH, OW):
    cp = y_ref.shape[-1]                      # lane-padded Cout (multiple of 128)
    cin_p = x_ref.shape[-1]
    xw = x_ref[0]                             # (H+2p, W+2p, Cin_p), bf16

    # Conv2d (stride 1) as KH*KW accumulated bf16 MXU matmuls: no im2col in HBM.
    acc = jnp.zeros((OH * OW, cp), jnp.float32)
    for kh in range(KH):
        for kw in range(KW):
            tap = xw[kh:kh + OH, kw:kw + OW, :].reshape(OH * OW, cin_p)
            acc = acc + jnp.dot(tap, w_ref[kh * KW + kw],
                                preferred_element_type=jnp.float32)

    acc = acc + bias_ref[0:1, :]              # conv bias
    acc = jnp.maximum(acc, 0.0)               # ReLU

    # Time-embedding Linear for this sample: (1, T) @ (T, Cp) on the MXU.
    tproj = jnp.dot(te_ref[0], wt_ref[...],
                    preferred_element_type=jnp.float32) + bias_ref[1:2, :]
    acc = acc + tproj                         # broadcast over all OH*OW rows

    y_ref[0] = acc.reshape(OH, OW, cp)        # pre-BN activations (f32)

    # BatchNorm partial statistics for this sample (summed over OH*OW rows).
    stats_ref[0, 0:1, :] = jnp.sum(acc, axis=0, keepdims=True)
    stats_ref[0, 1:2, :] = jnp.sum(acc * acc, axis=0, keepdims=True)


# ---------------------------------------------------------------------------
# Phase 2: BatchNorm normalize (train-mode batch stats, biased var) fused with
#          MaxPool2d(kernel=2, stride=2).
# Grid: (N, PH // TPH) -- both axes "parallel".
# Pooling is done on loaded values (contiguous loads + reshapes + max), so no
# strided ref indexing is needed.
# ---------------------------------------------------------------------------
def _bn_pool_kernel(stats_ref, gb_ref, y_ref, o_ref, *, PW, TPH, M_total):
    cp = o_ref.shape[-1]
    # Re-derive the global BN scale/shift from the tiny (N, 2, Cp) partial
    # stats on every step: no cross-step scratch state, so both grid axes stay
    # "parallel" (megacore-safe).
    s = jnp.sum(stats_ref[...], axis=0)                       # (2, Cp)
    inv_m = 1.0 / float(M_total)
    mean = s[0:1, :] * inv_m
    var = s[1:2, :] * inv_m - mean * mean                     # biased (train)
    scale = gb_ref[0:1, :] * lax.rsqrt(var + BN_EPS)          # gamma/sqrt(var+eps)
    shift = gb_ref[1:2, :] - mean * scale                     # beta - mean*scale

    blk = y_ref[0]                                            # (2*TPH, OW, Cp)
    # Normalize first (gamma may be negative), then take the 2x2 window max.
    norm = blk * scale + shift                                # broadcast over rows
    # Row pooling: pair adjacent input rows (major-dim split, free).
    norm = norm.reshape(TPH, 2, norm.shape[1], cp)
    rmax = jnp.max(norm, axis=1)                              # (TPH, OW, Cp)
    # Column pooling: drop odd remainder (PyTorch floor), pair adjacent cols.
    rmax = rmax[:, :2 * PW, :].reshape(TPH, PW, 2, cp)
    o_ref[0] = jnp.max(rmax, axis=2)                          # (TPH, PW, Cp)


# ---------------------------------------------------------------------------
# Wrapper (glue: layout plumbing only — no im2col expansion, no one-hot)
# ---------------------------------------------------------------------------
@functools.partial(jax.jit, static_argnames=("stride", "padding"))
def conv_block_forward(x_nchw, t_emb, params, *, stride=1, padding=1):
    w, b, wt, bt, gamma, beta = params
    if stride != 1:
        # TODO(synk): stride > 1 needs strided tap slicing in-kernel.
        raise NotImplementedError("Pallas ConvBlock currently supports stride=1.")

    N, Cin, H, W = x_nchw.shape
    Cout, _, KH, KW = w.shape
    T = t_emb.shape[1]
    OH = H + 2 * padding - KH + 1
    OW = W + 2 * padding - KW + 1
    PH, PW = OH // 2, OW // 2            # MaxPool2d(2) floors odd spatial dims

    cp = _round_up(Cout, LANE)           # lane-dense channel dim
    cin_p = _round_up(Cin, 8)
    t_p = _round_up(T, 8)
    hp, wp = H + 2 * padding, W + 2 * padding

    f32, bf16 = jnp.float32, jnp.bfloat16

    # ---- glue: pad + relayout inputs ---------------------------------------
    x = jnp.transpose(x_nchw, (0, 2, 3, 1)).astype(f32)               # NHWC
    x = jnp.pad(x, ((0, 0), (padding, padding), (padding, padding),
                    (0, cin_p - Cin))).astype(bf16)                   # (N,hp,wp,cin_p)

    # Conv weight OIHW -> (KH*KW, Cin_p, Cp), bf16 (MXU operand).
    w_k = jnp.transpose(w, (2, 3, 1, 0)).reshape(KH * KW, Cin, Cout)
    w_k = jnp.pad(w_k, ((0, 0), (0, cin_p - Cin), (0, cp - Cout))).astype(bf16)

    wt_p = jnp.pad(wt, ((0, t_p - T), (0, cp - Cout))).astype(bf16)   # (t_p, cp)
    te_p = jnp.pad(t_emb, ((0, 0), (0, t_p - T))).astype(bf16).reshape(N, 1, t_p)

    pad_c = (0, cp - Cout)
    bias2 = jnp.stack([jnp.pad(b.astype(f32), pad_c),
                       jnp.pad(bt.astype(f32), pad_c)])               # (2, cp)
    gb2 = jnp.stack([jnp.pad(gamma.astype(f32), pad_c),
                     jnp.pad(beta.astype(f32), pad_c)])               # (2, cp)

    # ---- phase 1: conv + ReLU + time-emb + BN partial stats ----------------
    kern1 = functools.partial(_conv_stats_kernel, KH=KH, KW=KW, OH=OH, OW=OW)
    flops1 = 2 * N * OH * OW * (KH * KW * cin_p) * cp + 2 * N * t_p * cp
    bytes1 = (x.size * 2 + w_k.size * 2 + wt_p.size * 2 + te_p.size * 2
              + bias2.size * 4 + N * OH * OW * cp * 4 + N * 2 * cp * 4)
    y_act, stats = pl.pallas_call(
        kern1,
        grid=(N,),
        in_specs=[
            pl.BlockSpec((1, hp, wp, cin_p), lambda n: (n, 0, 0, 0)),
            pl.BlockSpec((KH * KW, cin_p, cp), lambda n: (0, 0, 0)),  # resident
            pl.BlockSpec((1, 1, t_p), lambda n: (n, 0, 0)),
            pl.BlockSpec((t_p, cp), lambda n: (0, 0)),                # resident
            pl.BlockSpec((2, cp), lambda n: (0, 0)),                  # resident
        ],
        out_specs=[
            pl.BlockSpec((1, OH, OW, cp), lambda n: (n, 0, 0, 0)),
            pl.BlockSpec((1, 2, cp), lambda n: (n, 0, 0)),
        ],
        out_shape=[
            jax.ShapeDtypeStruct((N, OH, OW, cp), f32),    # pre-BN activations
            jax.ShapeDtypeStruct((N, 2, cp), f32),         # per-sample [sum,sumsq]
        ],
        compiler_params=pltpu.CompilerParams(
            dimension_semantics=("parallel",),
            vmem_limit_bytes=32 * 1024 * 1024),
        cost_estimate=pl.CostEstimate(flops=flops1, transcendentals=0,
                                      bytes_accessed=bytes1),
    )(x, w_k, te_p, wt_p, bias2)

    # ---- phase 2: BN normalize + fused 2x2 max-pool -------------------------
    TPH = next(d for d in (4, 2, 1) if PH % d == 0)     # pooled rows per step
    kern2 = functools.partial(_bn_pool_kernel, PW=PW, TPH=TPH,
                              M_total=N * OH * OW)
    flops2 = 10 * N * OH * OW * cp
    bytes2 = (y_act.size * 4 + stats.size * 4 + gb2.size * 4
              + N * PH * PW * cp * 4)
    pooled = pl.pallas_call(
        kern2,
        grid=(N, PH // TPH),
        in_specs=[
            pl.BlockSpec((N, 2, cp), lambda n, j: (0, 0, 0)),          # resident
            pl.BlockSpec((2, cp), lambda n, j: (0, 0)),                # resident
            pl.BlockSpec((1, 2 * TPH, OW, cp), lambda n, j: (n, j, 0, 0)),
        ],
        out_specs=pl.BlockSpec((1, TPH, PW, cp), lambda n, j: (n, j, 0, 0)),
        out_shape=jax.ShapeDtypeStruct((N, PH, PW, cp), f32),
        compiler_params=pltpu.CompilerParams(
            dimension_semantics=("parallel", "parallel"),
            vmem_limit_bytes=32 * 1024 * 1024),
        cost_estimate=pl.CostEstimate(flops=flops2, transcendentals=N * cp,
                                      bytes_accessed=bytes2),
    )(stats, gb2, y_act)

    # ---- glue: unpad channels, back to NCHW ---------------------------------
    out = pooled[:, :, :, :Cout]
    return jnp.transpose(out, (0, 3, 1, 2))


# ---------------------------------------------------------------------------
# Pure-JAX reference (module-faithful, f32) for the correctness check.
# ---------------------------------------------------------------------------
def reference_forward(x, t_emb, params):
    w, b, wt, bt, gamma, beta = params
    y = lax.conv_general_dilated(x, w, (1, 1), ((1, 1), (1, 1)),
                                 dimension_numbers=("NCHW", "OIHW", "NCHW"))
    y = y + b.reshape(1, -1, 1, 1)
    y = jnp.maximum(y, 0.0)
    y = y + (t_emb @ wt + bt)[:, :, None, None]
    mean = y.mean(axis=(0, 2, 3), keepdims=True)
    var = jnp.square(y - mean).mean(axis=(0, 2, 3), keepdims=True)
    y = (y - mean) * lax.rsqrt(var + BN_EPS) * gamma.reshape(1, -1, 1, 1) \
        + beta.reshape(1, -1, 1, 1)
    N, C, H, W = y.shape
    return y.reshape(N, C, H // 2, 2, W // 2, 2).max(axis=(3, 5))


def _bf16_round(a):
    return a.astype(jnp.bfloat16).astype(jnp.float32)


# ---------------------------------------------------------------------------
if __name__ == "__main__":
    # ConvBlock(in=4, out=8, k=3, stride=1, padding=1, time_emb_channels=32,
    #           use_time_emb=True, use_batchnorm=True, use_maxpool=True)
    N, Cin, H, W = 2, 4, 16, 16
    Cout, KH, KW = 8, 3, 3
    T = 32

    key = jax.random.PRNGKey(0)
    k_x, k_t, k_w, k_b, k_wt, k_bt = jax.random.split(key, 6)

    x = jax.random.normal(k_x, (N, Cin, H, W), dtype=jnp.float32)
    t_emb = jax.random.normal(k_t, (N, T), dtype=jnp.float32)

    w = 0.1 * jax.random.normal(k_w, (Cout, Cin, KH, KW), dtype=jnp.float32)
    b = 0.1 * jax.random.normal(k_b, (Cout,), dtype=jnp.float32)
    wt = 0.1 * jax.random.normal(k_wt, (T, Cout), dtype=jnp.float32)   # Linear (in, out)
    bt = 0.1 * jax.random.normal(k_bt, (Cout,), dtype=jnp.float32)
    gamma = jnp.ones((Cout,), dtype=jnp.float32)
    beta = jnp.zeros((Cout,), dtype=jnp.float32)
    params = (w, b, wt, bt, gamma, beta)
    # TODO(synk): BatchNorm2d running_mean/running_var buffer updates (stateful
    # training bookkeeping) are not modeled; forward uses batch stats (.train()).

    out = jax.block_until_ready(conv_block_forward(x, t_emb, params))
    assert out.shape == (N, Cout, H // 2, W // 2), out.shape

    # Tight check: same math with the matmul operands rounded to bf16
    # (f32 accumulation), matching the kernel's MXU precision.
    ref_matched = reference_forward(
        _bf16_round(x), _bf16_round(t_emb),
        (_bf16_round(w), b, _bf16_round(wt), bt, gamma, beta))
    assert jnp.allclose(out, ref_matched, atol=2e-3, rtol=2e-3), \
        float(jnp.max(jnp.abs(out - ref_matched)))

    # Coarse sanity bound vs. the pure-f32 module math (allows bf16 MXU drift).
    ref_f32 = reference_forward(x, t_emb, params)
    assert float(jnp.max(jnp.abs(out - ref_f32))) < 0.1

    print("KERNEL_OK")
</pallas_src>

<mosaic_0001>
module attributes {stable_mosaic.version = 11 : i64} {
  func.func @_bn_pool_kernel(%arg0: i32, %arg1: i32, %arg2: memref<2x2x128xf32, #tpu.memory_space<vmem>>, %arg3: memref<2x128xf32, #tpu.memory_space<vmem>>, %arg4: memref<1x8x16x128xf32, #tpu.memory_space<vmem>>, %arg5: memref<1x4x8x128xf32, #tpu.memory_space<vmem>>) attributes {dimension_semantics = [#tpu.dimension_semantics<parallel>, #tpu.dimension_semantics<parallel>], iteration_bounds = array<i64: 2, 2>, scalar_prefetch = 0 : i64, scratch_operands = 0 : i64, tpu.core_type = #tpu.core_type<tc>, window_params = [{pipeline_mode = #tpu.pipeline_mode<synchronous>, transform_indices = @transform_0, window_bounds = array<i64: 2, 2, 128>}, {pipeline_mode = #tpu.pipeline_mode<synchronous>, transform_indices = @transform_1, window_bounds = array<i64: 2, 128>}, {transform_indices = @transform_2, window_bounds = array<i64: 1, 8, 16, 128>}, {transform_indices = @transform_3, window_bounds = array<i64: 1, 4, 8, 128>}]} {
    %c0 = arith.constant 0 : index
    %c0_0 = arith.constant 0 : index
    %c0_1 = arith.constant 0 : index
    %0 = vector.load %arg2[%c0, %c0_0, %c0_1] : memref<2x2x128xf32, #tpu.memory_space<vmem>>, vector<2x2x128xf32>
    %cst = arith.constant dense<0.000000e+00> : vector<2x128xf32>
    %1 = vector.multi_reduction <add>, %0, %cst [0] : vector<2x2x128xf32> to vector<2x128xf32>
    %2 = vector.extract_strided_slice %1 {offsets = [0, 0], sizes = [1, 128], strides = [1, 1]} : vector<2x128xf32> to vector<1x128xf32>
    %cst_2 = arith.constant 0.001953125 : f32
    %3 = vector.broadcast %cst_2 : f32 to vector<1x128xf32>
    %4 = arith.mulf %2, %3 : vector<1x128xf32>
    %5 = vector.extract_strided_slice %1 {offsets = [1, 0], sizes = [1, 128], strides = [1, 1]} : vector<2x128xf32> to vector<1x128xf32>
    %cst_3 = arith.constant 0.001953125 : f32
    %6 = vector.broadcast %cst_3 : f32 to vector<1x128xf32>
    %7 = arith.mulf %5, %6 : vector<1x128xf32>
    %8 = arith.mulf %4, %4 : vector<1x128xf32>
    %9 = arith.subf %7, %8 : vector<1x128xf32>
    %c0_4 = arith.constant 0 : index
    %c0_5 = arith.constant 0 : index
    %10 = vector.load %arg3[%c0_4, %c0_5] : memref<2x128xf32, #tpu.memory_space<vmem>>, vector<1x128xf32>
    %cst_6 = arith.constant 9.99999974E-6 : f32
    %11 = vector.broadcast %cst_6 : f32 to vector<1x128xf32>
    %12 = arith.addf %9, %11 : vector<1x128xf32>
    %13 = math.rsqrt %12 : vector<1x128xf32>
    %14 = arith.mulf %10, %13 : vector<1x128xf32>
    %c1 = arith.constant 1 : index
    %c0_7 = arith.constant 0 : index
    %15 = vector.load %arg3[%c1, %c0_7] : memref<2x128xf32, #tpu.memory_space<vmem>>, vector<1x128xf32>
    %16 = arith.mulf %4, %14 : vector<1x128xf32>
    %17 = arith.subf %15, %16 : vector<1x128xf32>
    %c0_8 = arith.constant 0 : index
    %c0_9 = arith.constant 0 : index
    %c0_10 = arith.constant 0 : index
    %c0_11 = arith.constant 0 : index
    %18 = vector.load %arg4[%c0_8, %c0_9, %c0_10, %c0_11] : memref<1x8x16x128xf32, #tpu.memory_space<vmem>>, vector<1x8x16x128xf32>
    %19 = vector.shape_cast %18 : vector<1x8x16x128xf32> to vector<8x16x128xf32>
    %20 = vector.shape_cast %14 : vector<1x128xf32> to vector<1x1x128xf32>
    %21 = vector.broadcast %20 : vector<1x1x128xf32> to vector<8x16x128xf32>
    %22 = arith.mulf %19, %21 : vector<8x16x128xf32>
    %23 = vector.shape_cast %17 : vector<1x128xf32> to vector<1x1x128xf32>
    %24 = vector.broadcast %23 : vector<1x1x128xf32> to vector<8x16x128xf32>
    %25 = arith.addf %22, %24 : vector<8x16x128xf32>
    %26 = vector.shape_cast %25 : vector<8x16x128xf32> to vector<4x2x16x128xf32>
    %cst_12 = arith.constant dense<0xFF800000> : vector<4x16x128xf32>
    %27 = vector.multi_reduction <maximumf>, %26, %cst_12 [1] : vector<4x2x16x128xf32> to vector<4x16x128xf32>
    %28 = vector.shape_cast %27 : vector<4x16x128xf32> to vector<4x8x2x128xf32>
    %cst_13 = arith.constant dense<0xFF800000> : vector<4x8x128xf32>
    %29 = vector.multi_reduction <maximumf>, %28, %cst_13 [2] : vector<4x8x2x128xf32> to vector<4x8x128xf32>
    %c0_14 = arith.constant 0 : index
    %c0_15 = arith.constant 0 : index
    %c0_16 = arith.constant 0 : index
    %c0_17 = arith.constant 0 : index
    %30 = vector.load %arg5[%c0_14, %c0_15, %c0_16, %c0_17] : memref<1x4x8x128xf32, #tpu.memory_space<vmem>>, vector<1x4x8x128xf32>
    %31 = vector.shape_cast %30 : vector<1x4x8x128xf32> to vector<4x8x128xf32>
    %32 = vector.shape_cast %29 : vector<4x8x128xf32> to vector<1x4x8x128xf32>
    tpu.vector_store %arg5[%c0_14, %c0_15, %c0_16, %c0_17], %32 {strides = array<i32>} : memref<1x4x8x128xf32, #tpu.memory_space<vmem>>, vector<1x4x8x128xf32>,
    return
  }
  func.func @transform_0(%arg0: i32, %arg1: i32) -> (i32, i32, i32) {
    %c0_i32 = arith.constant 0 : i32
    %c0_i32_0 = arith.constant 0 : i32
    %c0_i32_1 = arith.constant 0 : i32
    %c0_i32_2 = arith.constant 0 : i32
    return %c0_i32, %c0_i32_0, %c0_i32_1 : i32, i32, i32
  }
  func.func @transform_1(%arg0: i32, %arg1: i32) -> (i32, i32) {
    %c0_i32 = arith.constant 0 : i32
    %c0_i32_0 = arith.constant 0 : i32
    %c0_i32_1 = arith.constant 0 : i32
    return %c0_i32, %c0_i32_0 : i32, i32
  }
  func.func @transform_2(%arg0: i32, %arg1: i32) -> (i32, i32, i32, i32) {
    %c0_i32 = arith.constant 0 : i32
    %c0_i32_0 = arith.constant 0 : i32
    %c0_i32_1 = arith.constant 0 : i32
    return %arg0, %arg1, %c0_i32, %c0_i32_0 : i32, i32, i32, i32
  }
  func.func @transform_3(%arg0: i32, %arg1: i32) -> (i32, i32, i32, i32) {
    %c0_i32 = arith.constant 0 : i32
    %c0_i32_0 = arith.constant 0 : i32
    %c0_i32_1 = arith.constant 0 : i32
    return %arg0, %arg1, %c0_i32, %c0_i32_0 : i32, i32, i32, i32
  }
}

module attributes {stable_mosaic.version = 11 : i64} {
  func.func @_conv_stats_kernel(%arg0: i32, %arg1: memref<1x18x18x8xbf16, #tpu.memory_space<vmem>>, %arg2: memref<9x8x128xbf16, #tpu.memory_space<vmem>>, %arg3: memref<1x1x32xbf16, #tpu.memory_space<vmem>>, %arg4: memref<32x128xbf16, #tpu.memory_space<vmem>>, %arg5: memref<2x128xf32, #tpu.memory_space<vmem>>, %arg6: memref<1x16x16x128xf32, #tpu.memory_space<vmem>>, %arg7: memref<1x2x128xf32, #tpu.memory_space<vmem>>) attributes {dimension_semantics = [#tpu.dimension_semantics<parallel>], iteration_bounds = array<i64: 2>, scalar_prefetch = 0 : i64, scratch_operands = 0 : i64, tpu.core_type = #tpu.core_type<tc>, window_params = [{transform_indices = @transform_0, window_bounds = array<i64: 1, 18, 18, 8>}, {pipeline_mode = #tpu.pipeline_mode<synchronous>, transform_indices = @transform_1, window_bounds = array<i64: 9, 8, 128>}, {transform_indices = @transform_2, window_bounds = array<i64: 1, 1, 32>}, {pipeline_mode = #tpu.pipeline_mode<synchronous>, transform_indices = @transform_3, window_bounds = array<i64: 32, 128>}, {pipeline_mode = #tpu.pipeline_mode<synchronous>, transform_indices = @transform_4, window_bounds = array<i64: 2, 128>}, {transform_indices = @transform_5, window_bounds = array<i64: 1, 16, 16, 128>}, {transform_indices = @transform_6, window_bounds = array<i64: 1, 2, 128>}]} {
    %c0 = arith.constant 0 : index
    %c0_0 = arith.constant 0 : index
    %c0_1 = arith.constant 0 : index
    %c0_2 = arith.constant 0 : index
    %0 = vector.load %arg1[%c0, %c0_0, %c0_1, %c0_2] : memref<1x18x18x8xbf16, #tpu.memory_space<vmem>>, vector<1x18x18x8xbf16>
    %1 = vector.shape_cast %0 : vector<1x18x18x8xbf16> to vector<18x18x8xbf16>
    %cst = arith.constant 0.000000e+00 : f32
    %2 = vector.broadcast %cst : f32 to vector<256x128xf32>
    %3 = vector.extract_strided_slice %1 {offsets = [0, 0, 0], sizes = [16, 16, 8], strides = [1, 1, 1]} : vector<18x18x8xbf16> to vector<16x16x8xbf16>
    %4 = vector.shape_cast %3 : vector<16x16x8xbf16> to vector<256x8xbf16>
    %c0_3 = arith.constant 0 : index
    %c0_4 = arith.constant 0 : index
    %c0_5 = arith.constant 0 : index
    %5 = vector.load %arg2[%c0_3, %c0_4, %c0_5] : memref<9x8x128xbf16, #tpu.memory_space<vmem>>, vector<1x8x128xbf16>
    %6 = vector.shape_cast %5 : vector<1x8x128xbf16> to vector<8x128xbf16>
    %cst_6 = arith.constant dense<0.000000e+00> : vector<256x128xf32>
    %7 = tpu.matmul %4, %6, %cst_6 {dimension_numbers = #tpu.dot_dimension_numbers<[1], [0], [0], [1], [0, 0, 1, 1], [], []>} : vector<256x8xbf16>, vector<8x128xbf16>, vector<256x128xf32> -> vector<256x128xf32>
    %8 = arith.addf %2, %7 : vector<256x128xf32>
    %9 = vector.extract_strided_slice %1 {offsets = [0, 1, 0], sizes = [16, 16, 8], strides = [1, 1, 1]} : vector<18x18x8xbf16> to vector<16x16x8xbf16>
    %10 = vector.shape_cast %9 : vector<16x16x8xbf16> to vector<256x8xbf16>
    %c1 = arith.constant 1 : index
    %c0_7 = arith.constant 0 : index
    %c0_8 = arith.constant 0 : index
    %11 = vector.load %arg2[%c1, %c0_7, %c0_8] : memref<9x8x128xbf16, #tpu.memory_space<vmem>>, vector<1x8x128xbf16>
    %12 = vector.shape_cast %11 : vector<1x8x128xbf16> to vector<8x128xbf16>
    %cst_9 = arith.constant dense<0.000000e+00> : vector<256x128xf32>
    %13 = tpu.matmul %10, %12, %cst_9 {dimension_numbers = #tpu.dot_dimension_numbers<[1], [0], [0], [1], [0, 0, 1, 1], [], []>} : vector<256x8xbf16>, vector<8x128xbf16>, vector<256x128xf32> -> vector<256x128xf32>
    %14 = arith.addf %8, %13 : vector<256x128xf32>
    %15 = vector.extract_strided_slice %1 {offsets = [0, 2, 0], sizes = [16, 16, 8], strides = [1, 1, 1]} : vector<18x18x8xbf16> to vector<16x16x8xbf16>
    %16 = vector.shape_cast %15 : vector<16x16x8xbf16> to vector<256x8xbf16>
    %c2 = arith.constant 2 : index
    %c0_10 = arith.constant 0 : index
    %c0_11 = arith.constant 0 : index
    %17 = vector.load %arg2[%c2, %c0_10, %c0_11] : memref<9x8x128xbf16, #tpu.memory_space<vmem>>, vector<1x8x128xbf16>
    %18 = vector.shape_cast %17 : vector<1x8x128xbf16> to vector<8x128xbf16>
    %cst_12 = arith.constant dense<0.000000e+00> : vector<256x128xf32>
    %19 = tpu.matmul %16, %18, %cst_12 {dimension_numbers = #tpu.dot_dimension_numbers<[1], [0], [0], [1], [0, 0, 1, 1], [], []>} : vector<256x8xbf16>, vector<8x128xbf16>, vector<256x128xf32> -> vector<256x128xf32>
    %20 = arith.addf %14, %19 : vector<256x128xf32>
    %21 = vector.extract_strided_slice %1 {offsets = [1, 0, 0], sizes = [16, 16, 8], strides = [1, 1, 1]} : vector<18x18x8xbf16> to vector<16x16x8xbf16>
    %22 = vector.shape_cast %21 : vector<16x16x8xbf16> to vector<256x8xbf16>
    %c3 = arith.constant 3 : index
    %c0_13 = arith.constant 0 : index
    %c0_14 = arith.constant 0 : index
    %23 = vector.load %arg2[%c3, %c0_13, %c0_14] : memref<9x8x128xbf16, #tpu.memory_space<vmem>>, vector<1x8x128xbf16>
    %24 = vector.shape_cast %23 : vector<1x8x128xbf16> to vector<8x128xbf16>
    %cst_15 = arith.constant dense<0.000000e+00> : vector<256x128xf32>
    %25 = tpu.matmul %22, %24, %cst_15 {dimension_numbers = #tpu.dot_dimension_numbers<[1], [0], [0], [1], [0, 0, 1, 1], [], []>} : vector<256x8xbf16>, vector<8x128xbf16>, vector<256x128xf32> -> vector<256x128xf32>
    %26 = arith.addf %20, %25 : vector<256x128xf32>
    %27 = vector.extract_strided_slice %1 {offsets = [1, 1, 0], sizes = [16, 16, 8], strides = [1, 1, 1]} : vector<18x18x8xbf16> to vector<16x16x8xbf16>
    %28 = vector.shape_cast %27 : vector<16x16x8xbf16> to vector<256x8xbf16>
    %c4 = arith.constant 4 : index
    %c0_16 = arith.constant 0 : index
    %c0_17 = arith.constant 0 : index
    %29 = vector.load %arg2[%c4, %c0_16, %c0_17] : memref<9x8x128xbf16, #tpu.memory_space<vmem>>, vector<1x8x128xbf16>
    %30 = vector.shape_cast %29 : vector<1x8x128xbf16> to vector<8x128xbf16>
    %cst_18 = arith.constant dense<0.000000e+00> : vector<256x128xf32>
    %31 = tpu.matmul %28, %30, %cst_18 {dimension_numbers = #tpu.dot_dimension_numbers<[1], [0], [0], [1], [0, 0, 1, 1], [], []>} : vector<256x8xbf16>, vector<8x128xbf16>, vector<256x128xf32> -> vector<256x128xf32>
    %32 = arith.addf %26, %31 : vector<256x128xf32>
    %33 = vector.extract_strided_slice %1 {offsets = [1, 2, 0], sizes = [16, 16, 8], strides = [1, 1, 1]} : vector<18x18x8xbf16> to vector<16x16x8xbf16>
    %34 = vector.shape_cast %33 : vector<16x16x8xbf16> to vector<256x8xbf16>
    %c5 = arith.constant 5 : index
    %c0_19 = arith.constant 0 : index
    %c0_20 = arith.constant 0 : index
    %35 = vector.load %arg2[%c5, %c0_19, %c0_20] : memref<9x8x128xbf16, #tpu.memory_space<vmem>>, vector<1x8x128xbf16>
    %36 = vector.shape_cast %35 : vector<1x8x128xbf16> to vector<8x128xbf16>
    %cst_21 = arith.constant dense<0.000000e+00> : vector<256x128xf32>
    %37 = tpu.matmul %34, %36, %cst_21 {dimension_numbers = #tpu.dot_dimension_numbers<[1], [0], [0], [1], [0, 0, 1, 1], [], []>} : vector<256x8xbf16>, vector<8x128xbf16>, vector<256x128xf32> -> vector<256x128xf32>
    %38 = arith.addf %32, %37 : vector<256x128xf32>
    %39 = vector.extract_strided_slice %1 {offsets = [2, 0, 0], sizes = [16, 16, 8], strides = [1, 1, 1]} : vector<18x18x8xbf16> to vector<16x16x8xbf16>
    %40 = vector.shape_cast %39 : vector<16x16x8xbf16> to vector<256x8xbf16>
    %c6 = arith.constant 6 : index
    %c0_22 = arith.constant 0 : index
    %c0_23 = arith.constant 0 : index
    %41 = vector.load %arg2[%c6, %c0_22, %c0_23] : memref<9x8x128xbf16, #tpu.memory_space<vmem>>, vector<1x8x128xbf16>
    %42 = vector.shape_cast %41 : vector<1x8x128xbf16> to vector<8x128xbf16>
    %cst_24 = arith.constant dense<0.000000e+00> : vector<256x128xf32>
    %43 = tpu.matmul %40, %42, %cst_24 {dimension_numbers = #tpu.dot_dimension_numbers<[1], [0], [0], [1], [0, 0, 1, 1], [], []>} : vector<256x8xbf16>, vector<8x128xbf16>, vector<256x128xf32> -> vector<256x128xf32>
    %44 = arith.addf %38, %43 : vector<256x128xf32>
    %45 = vector.extract_strided_slice %1 {offsets = [2, 1, 0], sizes = [16, 16, 8], strides = [1, 1, 1]} : vector<18x18x8xbf16> to vector<16x16x8xbf16>
    %46 = vector.shape_cast %45 : vector<16x16x8xbf16> to vector<256x8xbf16>
    %c7 = arith.constant 7 : index
    %c0_25 = arith.constant 0 : index
    %c0_26 = arith.constant 0 : index
    %47 = vector.load %arg2[%c7, %c0_25, %c0_26] : memref<9x8x128xbf16, #tpu.memory_space<vmem>>, vector<1x8x128xbf16>
    %48 = vector.shape_cast %47 : vector<1x8x128xbf16> to vector<8x128xbf16>
    %cst_27 = arith.constant dense<0.000000e+00> : vector<256x128xf32>
    %49 = tpu.matmul %46, %48, %cst_27 {dimension_numbers = #tpu.dot_dimension_numbers<[1], [0], [0], [1], [0, 0, 1, 1], [], []>} : vector<256x8xbf16>, vector<8x128xbf16>, vector<256x128xf32> -> vector<256x128xf32>
    %50 = arith.addf %44, %49 : vector<256x128xf32>
    %51 = vector.extract_strided_slice %1 {offsets = [2, 2, 0], sizes = [16, 16, 8], strides = [1, 1, 1]} : vector<18x18x8xbf16> to vector<16x16x8xbf16>
    %52 = vector.shape_cast %51 : vector<16x16x8xbf16> to vector<256x8xbf16>
    %c8 = arith.constant 8 : index
    %c0_28 = arith.constant 0 : index
    %c0_29 = arith.constant 0 : index
    %53 = vector.load %arg2[%c8, %c0_28, %c0_29] : memref<9x8x128xbf16, #tpu.memory_space<vmem>>, vector<1x8x128xbf16>
    %54 = vector.shape_cast %53 : vector<1x8x128xbf16> to vector<8x128xbf16>
    %cst_30 = arith.constant dense<0.000000e+00> : vector<256x128xf32>
    %55 = tpu.matmul %52, %54, %cst_30 {dimension_numbers = #tpu.dot_dimension_numbers<[1], [0], [0], [1], [0, 0, 1, 1], [], []>} : vector<256x8xbf16>, vector<8x128xbf16>, vector<256x128xf32> -> vector<256x128xf32>
    %56 = arith.addf %50, %55 : vector<256x128xf32>
    %c0_31 = arith.constant 0 : index
    %c0_32 = arith.constant 0 : index
    %57 = vector.load %arg5[%c0_31, %c0_32] : memref<2x128xf32, #tpu.memory_space<vmem>>, vector<1x128xf32>
    %58 = vector.broadcast %57 : vector<1x128xf32> to vector<256x128xf32>
    %59 = arith.addf %56, %58 : vector<256x128xf32>
    %cst_33 = arith.constant 0.000000e+00 : f32
    %60 = vector.broadcast %cst_33 : f32 to vector<256x128xf32>
    %61 = arith.maximumf %59, %60 : vector<256x128xf32>
    %c0_34 = arith.constant 0 : index
    %c0_35 = arith.constant 0 : index
    %c0_36 = arith.constant 0 : index
    %62 = vector.load %arg3[%c0_34, %c0_35, %c0_36] : memref<1x1x32xbf16, #tpu.memory_space<vmem>>, vector<1x1x32xbf16>
    %63 = vector.shape_cast %62 : vector<1x1x32xbf16> to vector<1x32xbf16>
    %c0_37 = arith.constant 0 : index
    %c0_38 = arith.constant 0 : index
    %64 = vector.load %arg4[%c0_37, %c0_38] : memref<32x128xbf16, #tpu.memory_space<vmem>>, vector<32x128xbf16>
    %cst_39 = arith.constant dense<0.000000e+00> : vector<1x128xf32>
    %65 = tpu.matmul %63, %64, %cst_39 {dimension_numbers = #tpu.dot_dimension_numbers<[1], [0], [0], [1], [0, 0, 1, 1], [], []>} : vector<1x32xbf16>, vector<32x128xbf16>, vector<1x128xf32> -> vector<1x128xf32>
    %c1_40 = arith.constant 1 : index
    %c0_41 = arith.constant 0 : index
    %66 = vector.load %arg5[%c1_40, %c0_41] : memref<2x128xf32, #tpu.memory_space<vmem>>, vector<1x128xf32>
    %67 = arith.addf %65, %66 : vector<1x128xf32>
    %68 = vector.broadcast %67 : vector<1x128xf32> to vector<256x128xf32>
    %69 = arith.addf %61, %68 : vector<256x128xf32>
    %70 = vector.shape_cast %69 : vector<256x128xf32> to vector<16x16x128xf32>
    %c0_42 = arith.constant 0 : index
    %c0_43 = arith.constant 0 : index
    %c0_44 = arith.constant 0 : index
    %c0_45 = arith.constant 0 : index
    %71 = vector.load %arg6[%c0_42, %c0_43, %c0_44, %c0_45] : memref<1x16x16x128xf32, #tpu.memory_space<vmem>>, vector<1x16x16x128xf32>
    %72 = vector.shape_cast %71 : vector<1x16x16x128xf32> to vector<16x16x128xf32>
    %73 = vector.shape_cast %70 : vector<16x16x128xf32> to vector<1x16x16x128xf32>
    tpu.vector_store %arg6[%c0_42, %c0_43, %c0_44, %c0_45], %73 {strides = array<i32>} : memref<1x16x16x128xf32, #tpu.memory_space<vmem>>, vector<1x16x16x128xf32>,
    %cst_46 = arith.constant dense<0.000000e+00> : vector<128xf32>
    %74 = vector.multi_reduction <add>, %69, %cst_46 [0] : vector<256x128xf32> to vector<128xf32>
    %75 = vector.shape_cast %74 : vector<128xf32> to vector<1x128xf32>
    %c0_47 = arith.constant 0 : index
    %c0_48 = arith.constant 0 : index
    %c0_49 = arith.constant 0 : index
    %76 = vector.load %arg7[%c0_47, %c0_48, %c0_49] : memref<1x2x128xf32, #tpu.memory_space<vmem>>, vector<1x1x128xf32>
    %77 = vector.shape_cast %76 : vector<1x1x128xf32> to vector<1x128xf32>
    %78 = vector.shape_cast %75 : vector<1x128xf32> to vector<1x1x128xf32>
    tpu.vector_store %arg7[%c0_47, %c0_48, %c0_49], %78 {strides = array<i32>} : memref<1x2x128xf32, #tpu.memory_space<vmem>>, vector<1x1x128xf32>,
    %79 = arith.mulf %69, %69 : vector<256x128xf32>
    %cst_50 = arith.constant dense<0.000000e+00> : vector<128xf32>
    %80 = vector.multi_reduction <add>, %79, %cst_50 [0] : vector<256x128xf32> to vector<128xf32>
    %81 = vector.shape_cast %80 : vector<128xf32> to vector<1x128xf32>
    %c0_51 = arith.constant 0 : index
    %c1_52 = arith.constant 1 : index
    %c0_53 = arith.constant 0 : index
    %82 = vector.load %arg7[%c0_51, %c1_52, %c0_53] : memref<1x2x128xf32, #tpu.memory_space<vmem>>, vector<1x1x128xf32>
    %83 = vector.shape_cast %82 : vector<1x1x128xf32> to vector<1x128xf32>
    %84 = vector.shape_cast %81 : vector<1x128xf32> to vector<1x1x128xf32>
    tpu.vector_store %arg7[%c0_51, %c1_52, %c0_53], %84 {strides = array<i32>} : memref<1x2x128xf32, #tpu.memory_space<vmem>>, vector<1x1x128xf32>,
    return
  }
  func.func @transform_0(%arg0: i32) -> (i32, i32, i32, i32) {
    %c0_i32 = arith.constant 0 : i32
    %c0_i32_0 = arith.constant 0 : i32
    %c0_i32_1 = arith.constant 0 : i32
    %c0_i32_2 = arith.constant 0 : i32
    return %arg0, %c0_i32, %c0_i32_0, %c0_i32_1 : i32, i32, i32, i32
  }
  func.func @transform_1(%arg0: i32) -> (i32, i32, i32) {
    %c0_i32 = arith.constant 0 : i32
    %c0_i32_0 = arith.constant 0 : i32
    %c0_i32_1 = arith.constant 0 : i32
    %c0_i32_2 = arith.constant 0 : i32
    return %c0_i32, %c0_i32_0, %c0_i32_1 : i32, i32, i32
  }
  func.func @transform_2(%arg0: i32) -> (i32, i32, i32) {
    %c0_i32 = arith.constant 0 : i32
    %c0_i32_0 = arith.constant 0 : i32
    %c0_i32_1 = arith.constant 0 : i32
    return %arg0, %c0_i32, %c0_i32_0 : i32, i32, i32
  }
  func.func @transform_3(%arg0: i32) -> (i32, i32) {
    %c0_i32 = arith.constant 0 : i32
    %c0_i32_0 = arith.constant 0 : i32
    %c0_i32_1 = arith.constant 0 : i32
    return %c0_i32, %c0_i32_0 : i32, i32
  }
  func.func @transform_4(%arg0: i32) -> (i32, i32) {
    %c0_i32 = arith.constant 0 : i32
    %c0_i32_0 = arith.constant 0 : i32
    %c0_i32_1 = arith.constant 0 : i32
    return %c0_i32, %c0_i32_0 : i32, i32
  }
  func.func @transform_5(%arg0: i32) -> (i32, i32, i32, i32) {
    %c0_i32 = arith.constant 0 : i32
    %c0_i32_0 = arith.constant 0 : i32
    %c0_i32_1 = arith.constant 0 : i32
    %c0_i32_2 = arith.constant 0 : i32
    return %arg0, %c0_i32, %c0_i32_0, %c0_i32_1 : i32, i32, i32, i32
  }
  func.func @transform_6(%arg0: i32) -> (i32, i32, i32) {
    %c0_i32 = arith.constant 0 : i32
    %c0_i32_0 = arith.constant 0 : i32
    %c0_i32_1 = arith.constant 0 : i32
    return %arg0, %c0_i32, %c0_i32_0 : i32, i32, i32
  }
}

</mosaic_0001>

<bundles_post_ra>
// kernel: conv_block_forward.3
= control target key start
LH: loop header
LB: loop body
LE: loop exit
PB: predicated region body
PF: predicated region fallthrough
CT: control target
= control target key end

     0   :  { %s985_s12 = smov 0   ;;  %s987_s13 = smov 0   ;;  %s1315_s0 = inlined_call_operand.vmem [shape: f32[2,2,128], index: 0, kind: input, shape index: {}]   ;;  %s1316_s1 = inlined_call_operand.vmem [shape: f32[2,128], index: 1, kind: input, shape index: {}]   ;;  %s1317_s2 = inlined_call_operand.vmem [shape: f32[2,16,16,128], index: 2, kind: input, shape index: {}]   ;;  %s1318_s3 = inlined_call_operand.vmem [shape: f32[2,8,8,128], index: 3, kind: output, shape index: {}]  }
   0x1   :  { %s989_s14 = smov 0   ;;  %s991_s15 = smov 0  }
   0x2   :  { %s993_s16 = smov 0  }
   0x3 LB: > { %s22_s17 = sadd.s32 1, %s954_s14  ;;  %s25_s18 = sadd.s32 1, %s958_s15  ;;  %s962_s16 = sphi %s993_s16, %s13_s16   ;;  %s958_s15 = sphi %s991_s15, %s1323_s15   ;;  %s954_s14 = sphi %s989_s14, %s1322_s14   ;;  %s950_s13 = sphi %s987_s13, %s1321_s13   ;;  %s946_s12 = sphi %s985_s12, %s1320_s12  }
   0x4   : > { %p23_p0 = scmp.ge.s32.totalorder %s22_s17, 2  ;;  %p871_p1 = scmp.ge.s32.totalorder %s962_s16, 1 }
   0x5   : > { %p159_p2 = scmp.lt.s32.totalorder %s962_s16, 5 }
   0x6   : > { %s1325_s17 = smov (%p23_p0, %s22_s17), 0  ;;  %s1327_s18 = smov (!%p23_p0, %s25_s18), %s958_s15 }
   0x7   : > { %p160_p3 = pnand %p871_p1, %p159_p2  ;;  %p27_p4 = scmp.ge.s32.totalorder %s1327_s18, 2 }
   0x8   : > { %v213_v0 = vld [vmem:[%s1315_s0] sm:$0x3] (!%p160_p3)  ;;  %v214_v1 = vld [vmem:[%s1315_s0 + $0x2] sm:$0x3] (!%p160_p3)  ;;  %vm215_vm0 = vcmask (!%p160_p3), 1041408   ;;  %s872_s23 = sshll.u32 (!%p160_p3), %s946_s12, 3  ;;  %v251_v10 = vlaneseq (!%p160_p3) }
   0x9   : > { %s1329_s18 = smov (%p27_p4, %s1327_s18), 0  ;;  %163 = sbr.rel (%p160_p3) target bundleno = 128 (0x80), region = 32 }
   0xa   : > { %v216_v2 = vsel (!%p160_p3), %vm215_vm0, %v213_v0, 0.0  ;;  %v217_v3 = vsel (!%p160_p3), %vm215_vm0, %v214_v1, 0.0  ;;  %p193_p5 = scmp.lt.s32.totalorder (!%p160_p3), %s950_s13, 1  ;;  %p195_p6 = scmp.lt.s32.totalorder (!%p160_p3), %s872_s23, 15  ;;  %v252_v11 = vshrl.u32 (!%p160_p3), %v251_v10, 7  ;;  %vm731_vm1 = vcmask (!%p160_p3), 1041409  }
   0xb   : > { %v218_v4 = vadd.f32 (!%p160_p3), %v217_v3, %v216_v2  ;;  %v225_v13 = vld [vmem:[%s1316_s1] sm:$0x1] (!%p160_p3)  ;;  %v964_v14 = vmov (!%p160_p3), 1983009808   ;;  %v232_v19 = vld [vmem:[%s1316_s1 + $0x1] sm:$0x1] (!%p160_p3) }
   0xc   : > { %v309_v15 = vunpack.c.l.s4 (!%p160_p3), %v964_v14  ;;  %v253_v17 = vsub.s32 (!%p160_p3), 0, %v252_v11  ;;  %s876_s8 = sshll.u32 (!%p160_p3), %s946_s12, 2  ;;  %vm733_vm2 = vcmask (!%p160_p3), 1042434   ;;  %vm735_vm3 = vcmask (!%p160_p3), 1043459  }
   0xd   : > { %v219_v5 = vmul.f32 (!%p160_p3), 0.001953125, %v218_v4  ;;  %p1215_p7 = scmp.lt.s32.totalorder (!%p160_p3), %s876_s8, 7  ;;  %vm737_vm4 = vcmask (!%p160_p3), 1044484   ;;  %vm739_vm5 = vcmask (!%p160_p3), 1045509   ;;  %vm741_vm6 = vcmask (!%p160_p3), 1046534  }
   0xe   : > { %v310_v21 = vunpack.c.0.s8 (!%p160_p3), %v309_v15  ;;  %vm743_vm7 = vcmask (!%p160_p3), 1047559  }
   0xf   : > { %v220_v6 = vmul.f32 (!%p160_p3), %v219_v5, %v219_v5 }
  0x10   : > { %s1331_s13 = smov (!%p193_p5, %s950_s13), 1  ;;  %s1333_s23 = smov (!%p195_p6, %s872_s23), 15  ;;  %v1038_v38 = vsub.s32 %v310_v21, %v252_v11 }
  0x11   : > { %v222_v7 = vrot.slane %v220_v6, 7  ;;  %s873_s24 = sshll.u32 %s1333_s23, 1  ;;  %s874_s25 = sshll.u32 %s1331_s13, 5 }
  0x12   : > { %s199_s26 = sadd.s32 %s874_s25, %s873_s24  ;;  %s1335_s8 = smov (!%p1215_p7, %s876_s8), 7 }
  0x13   : > { %v224_v8 = vsub.f32 %v219_v5, %v222_v7  ;;  %s875_s27 = sshll.u32 %s199_s26, 3  ;;  %s877_s10 = sshll.u32 %s1331_s13, 3 }
  0x14   : > { %s201_s5 = scalar_lea.vmem %s1317_s2, %s875_s27  ;;  %s209_s11 = sadd.s32 %s877_s10, %s1335_s8 }
  0x15   : > { %v226_v9 = vadd.f32 1e-05, %v224_v8  ;;  %v235_v20 = vld [vmem:[%s201_s5] sm:$0xff]  ;;  %v236_v23 = vld [vmem:[%s201_s5 + $0x8] sm:$0xff]  ;;  %v237_v24 = vld [vmem:[%s201_s5 + $0x10] sm:$0xff]  ;;  %s878_s12 = sshll.u32 %s209_s11, 3 }
  0x16   : > { %v238_v25 = vld [vmem:[%s201_s5 + $0x18] sm:$0xff]  ;;  %v239_v27 = vld [vmem:[%s201_s5 + $0x20] sm:$0xff]  ;;  %v240_v28 = vld [vmem:[%s201_s5 + $0x28] sm:$0xff]  ;;  %s211_s20 = scalar_lea.vmem %s1318_s3, %s878_s12 }
  0x17   : > { %922 = vrsqrt.f32 %v226_v9  ;;  %v241_v29 = vld [vmem:[%s201_s5 + $0x30] sm:$0xff]  ;;  %v242_v31 = vld [vmem:[%s201_s5 + $0x38] sm:$0xff]  ;;  %v243_v32 = vld [vmem:[%s201_s5 + $0x40] sm:$0xff] }
  0x18   : > { %v244_v33 = vld [vmem:[%s201_s5 + $0x48] sm:$0xff]  ;;  %v245_v34 = vld [vmem:[%s201_s5 + $0x50] sm:$0xff]  ;;  %v246_v35 = vld [vmem:[%s201_s5 + $0x58] sm:$0xff] }
  0x19   : > { %v247_v36 = vld [vmem:[%s201_s5 + $0x60] sm:$0xff]  ;;  %v248_v39 = vld [vmem:[%s201_s5 + $0x68] sm:$0xff]  ;;  %v249_v40 = vld [vmem:[%s201_s5 + $0x70] sm:$0xff] }
  0x1a   : > { %v250_v41 = vld [vmem:[%s201_s5 + $0x78] sm:$0xff] }
  0x21   : > { %v923_v12 = vpop.eup %922 }
  0x22   : > { %v229_v16 = vrot.slane %v923_v12, 1 }
  0x24   : > { %v231_v18 = vmul.f32 %v229_v16, %v225_v13 }
  0x26   : > { %v233_v22 = vmul.f32 %v231_v18, %v219_v5  ;;  %v254_v26 = vrot.slane %v231_v18, %v253_v17 }
  0x28   : > { %v234_v30 = vsub.f32 %v232_v19, %v233_v22  ;;  %v255_v37 = vmul.f32 %v254_v26, %v235_v20  ;;  %v256_v42 = vmul.f32 %v254_v26, %v236_v23  ;;  %v257_v43 = vmul.f32 %v254_v26, %v237_v24 }
  0x29   : > { %v258_v44 = vmul.f32 %v254_v26, %v238_v25  ;;  %v259_v45 = vmul.f32 %v254_v26, %v239_v27  ;;  %v260_v46 = vmul.f32 %v254_v26, %v240_v28  ;;  %v261_v47 = vmul.f32 %v254_v26, %v241_v29 }
  0x2a   : > { %v262_v48 = vmul.f32 %v254_v26, %v242_v31  ;;  %v263_v49 = vmul.f32 %v254_v26, %v243_v32  ;;  %v264_v50 = vmul.f32 %v254_v26, %v244_v33  ;;  %v265_v51 = vmul.f32 %v254_v26, %v245_v34 }
  0x2b   : > { %v266_v52 = vmul.f32 %v254_v26, %v246_v35  ;;  %v274_v53 = vrot.slane %v234_v30, %v253_v17  ;;  %v267_v54 = vmul.f32 %v254_v26, %v247_v36  ;;  %v268_v55 = vmul.f32 %v254_v26, %v248_v39 }
  0x2c   : > { %v269_v56 = vmul.f32 %v254_v26, %v249_v40  ;;  %v270_v57 = vmul.f32 %v254_v26, %v250_v41 }
  0x2d   : > { %v275_v58 = vadd.f32 %v274_v53, %v255_v37  ;;  %v276_v59 = vadd.f32 %v274_v53, %v256_v42  ;;  %v277_v60 = vadd.f32 %v274_v53, %v257_v43  ;;  %v278_v61 = vadd.f32 %v274_v53, %v258_v44 }
  0x2e   : > { %v279_v62 = vadd.f32 %v274_v53, %v259_v45  ;;  %v280_v63 = vadd.f32 %v274_v53, %v260_v46  ;;  %v281_v0 = vadd.f32 %v274_v53, %v261_v47  ;;  %v282_v1 = vadd.f32 %v274_v53, %v262_v48 }
  0x2f   : > { %v283_v2 = vadd.f32 %v274_v53, %v263_v49  ;;  %v284_v3 = vadd.f32 %v274_v53, %v264_v50  ;;  %v285_v4 = vadd.f32 %v274_v53, %v265_v51  ;;  %v286_v5 = vadd.f32 %v274_v53, %v266_v52 }
  0x30   : > { %v287_v6 = vadd.f32 %v274_v53, %v267_v54  ;;  %v288_v7 = vadd.f32 %v274_v53, %v268_v55  ;;  %v289_v8 = vadd.f32 %v274_v53, %v269_v56  ;;  %v290_v9 = vadd.f32 %v274_v53, %v270_v57 }
  0x31   : > { %v291_v10 = vmax.f32 %v275_v58, %v277_v60  ;;  %v292_v11 = vmax.f32 %v276_v59, %v278_v61  ;;  %v293_v12 = vmax.f32 %v279_v62, %v281_v0  ;;  %v294_v13 = vmax.f32 %v280_v63, %v282_v1 }
  0x32   : > { %v295_v14 = vmax.f32 %v283_v2, %v285_v4  ;;  %v296_v15 = vmax.f32 %v284_v3, %v286_v5  ;;  %v297_v24 = vmax.f32 %v287_v6, %v289_v8  ;;  %v298_v25 = vmax.f32 %v288_v7, %v290_v9 }
  0x33   : > { %v307_v16 = vcombine.high %v291_v10, %v291_v10  ;;  %v314_v17 = vrot.slane %v291_v10, %v1038_v38  ;;  %v324_v18 = vcombine.high %v292_v11, %v292_v11  ;;  %v331_v19 = vrot.slane %v292_v11, %v1038_v38 }
  0x34   : > { %v341_v20 = vcombine.high %v293_v12, %v293_v12  ;;  %v1043_v21 = vrot.slane %v293_v12, %v1038_v38  ;;  %v358_v22 = vcombine.high %v294_v13, %v294_v13  ;;  %v1046_v23 = vrot.slane %v294_v13, %v1038_v38 }
  0x35   : > { %v321_v26 = vrot.slane %v307_v16, %v1038_v38  ;;  %v338_v27 = vrot.slane %v324_v18, %v1038_v38  ;;  %v322_v28 = vcombine.high %v314_v17, %v314_v17  ;;  %v339_v29 = vcombine.high %v331_v19, %v331_v19 }
  0x36   : > { %v1051_v30 = vrot.slane %v341_v20, %v1038_v38  ;;  %v1054_v31 = vrot.slane %v358_v22, %v1038_v38  ;;  %v356_v32 = vcombine.high %v1043_v21, %v1043_v21  ;;  %v373_v33 = vcombine.high %v1046_v23, %v1046_v23 }
  0x37   : > { %v375_v34 = vcombine.high %v295_v14, %v295_v14  ;;  %v1061_v35 = vrot.slane %v295_v14, %v1038_v38  ;;  %v323_v36 = vcombine.high %v321_v26, %v321_v26  ;;  %v340_v37 = vcombine.high %v338_v27, %v338_v27 }
  0x38   : > { %v392_v39 = vcombine.high %v296_v15, %v296_v15  ;;  %v1064_v40 = vrot.slane %v296_v15, %v1038_v38  ;;  %v357_v41 = vcombine.high %v1051_v30, %v1051_v30  ;;  %v409_v43 = vcombine.high %v297_v24, %v297_v24 }
  0x39   : > { %v1069_v42 = vrot.slane %v375_v34, %v1038_v38  ;;  %v1072_v44 = vrot.slane %v297_v24, %v1038_v38  ;;  %v374_v45 = vcombine.high %v1054_v31, %v1054_v31  ;;  %v426_v47 = vcombine.high %v298_v25, %v298_v25 }
  0x3a   : > { %v1077_v46 = vrot.slane %v392_v39, %v1038_v38  ;;  %v1080_v48 = vrot.slane %v298_v25, %v1038_v38  ;;  %v390_v49 = vcombine.high %v1061_v35, %v1061_v35  ;;  %v407_v51 = vcombine.high %v1064_v40, %v1064_v40 }
  0x3b   : > { %v391_v50 = vcombine.high %v1069_v42, %v1069_v42  ;;  %v475_v52 = vsel %vm215_vm0, %v314_v17, -inf  ;;  %v1092_v54 = vrot.slane %v409_v43, %v1038_v38  ;;  %v424_v55 = vcombine.high %v1072_v44, %v1072_v44 }
  0x3c   : > { %v408_v53 = vcombine.high %v1077_v46, %v1077_v46  ;;  %v476_v56 = vrot.slane %v475_v52, 4  ;;  %v1097_v57 = vrot.slane %v426_v47, %v1038_v38  ;;  %v482_v58 = vsel %vm215_vm0, %v322_v28, -inf }
  0x3d   : > { %v489_v59 = vsel %vm215_vm0, %v321_v26, -inf  ;;  %v496_v60 = vsel %vm215_vm0, %v323_v36, -inf  ;;  %v441_v61 = vcombine.high %v1080_v48, %v1080_v48  ;;  %v483_v63 = vrot.slane %v482_v58, 4 }
  0x3e   : > { %v477_v62 = vmax.f32 %v475_v52, %v476_v56  ;;  %v490_v0 = vrot.slane %v489_v59, 4  ;;  %v497_v1 = vrot.slane %v496_v60, 4  ;;  %v503_v2 = vsel %vm215_vm0, %v331_v19, -inf }
  0x3f   : > { %v510_v3 = vsel %vm215_vm0, %v339_v29, -inf  ;;  %v517_v38 = vsel %vm215_vm0, %v338_v27, -inf  ;;  %v484_v5 = vmax.f32 %v482_v58, %v483_v63  ;;  %v504_v7 = vrot.slane %v503_v2, 4 }
  0x40   : > { %v478_v4 = vrot.slane %v477_v62, 2  ;;  %v491_v6 = vmax.f32 %v489_v59, %v490_v0  ;;  %v498_v8 = vmax.f32 %v496_v60, %v497_v1  ;;  %v511_v9 = vrot.slane %v510_v3, 4 }
  0x41   : > { %v518_v10 = vrot.slane %v517_v38, 4  ;;  %v524_v11 = vsel %vm215_vm0, %v340_v37, -inf  ;;  %v485_v13 = vrot.slane %v484_v5, 2  ;;  %v505_v15 = vmax.f32 %v503_v2, %v504_v7 }
  0x42   : > { %v479_v12 = vmax.f32 %v477_v62, %v478_v4  ;;  %v492_v14 = vrot.slane %v491_v6, 2  ;;  %v499_v16 = vrot.slane %v498_v8, 2  ;;  %v512_v17 = vmax.f32 %v510_v3, %v511_v9 }
  0x43   : > { %v519_v18 = vmax.f32 %v517_v38, %v518_v10  ;;  %v525_v19 = vrot.slane %v524_v11, 4  ;;  %v486_v22 = vmax.f32 %v484_v5, %v485_v13  ;;  %v506_v25 = vrot.slane %v505_v15, 2 }
  0x44   : > { %v480_v20 = vrot.slane %v479_v12, 1  ;;  %v493_v24 = vmax.f32 %v491_v6, %v492_v14  ;;  %v500_v26 = vmax.f32 %v498_v8, %v499_v16  ;;  %v513_v27 = vrot.slane %v512_v17, 2 }
  0x45   : > { %v520_v28 = vrot.slane %v519_v18, 2  ;;  %v526_v29 = vmax.f32 %v524_v11, %v525_v19  ;;  %v425_v34 = vcombine.high %v1092_v54, %v1092_v54  ;;  %v487_v36 = vrot.slane %v486_v22, 1 }
  0x46   : > { %v494_v37 = vrot.slane %v493_v24, 1  ;;  %v507_v39 = vmax.f32 %v505_v15, %v506_v25  ;;  %v501_v43 = vrot.slane %v500_v26, 1  ;;  %v514_v47 = vmax.f32 %v512_v17, %v513_v27 }
  0x47   : > { %v521_v52 = vmax.f32 %v519_v18, %v520_v28  ;;  %v527_v56 = vrot.slane %v526_v29, 2  ;;  %v442_v58 = vcombine.high %v1097_v57, %v1097_v57  ;;  %v1112_v59 = vmax.f32 %v479_v12, %v480_v20 }
  0x48   : > { %v508_v60 = vrot.slane %v507_v39, 1  ;;  %v531_v62 = vsel %vm215_vm0, %v1043_v21, -inf  ;;  %v1116_v63 = vmax.f32 %v486_v22, %v487_v36  ;;  %v1118_v0 = vmax.f32 %v493_v24, %v494_v37 }
  0x49   : > { %v515_v1 = vrot.slane %v514_v47, 1  ;;  %v528_v2 = vmax.f32 %v526_v29, %v527_v56  ;;  %v1120_v3 = vmax.f32 %v500_v26, %v501_v43  ;;  %v532_v38 = vrot.slane %v531_v62, 4 }
  0x4a   : > { %v538_v4 = vsel %vm215_vm0, %v356_v32, -inf  ;;  %v545_v5 = vsel %vm215_vm0, %v1051_v30, -inf  ;;  %v1128_v6 = vmax.f32 %v507_v39, %v508_v60  ;;  %v522_v8 = vrot.slane %v521_v52, 1 }
  0x4b   : > { %v1130_v7 = vmax.f32 %v514_v47, %v515_v1  ;;  %v539_v9 = vrot.slane %v538_v4, 4  ;;  %v533_v10 = vmax.f32 %v531_v62, %v532_v38  ;;  %v546_v11 = vrot.slane %v545_v5, 4 }
  0x4c   : > { %v552_v12 = vsel %vm215_vm0, %v357_v41, -inf  ;;  %v559_v21 = vsel %vm215_vm0, %v1046_v23, -inf  ;;  %v529_v32 = vrot.slane %v528_v2, 1  ;;  %v566_v18 = vsel %vm215_vm0, %v373_v33, -inf }
  0x4d   : > { %v540_v13 = vmax.f32 %v538_v4, %v539_v9  ;;  %v553_v14 = vrot.slane %v552_v12, 4  ;;  %v560_v15 = vrot.slane %v559_v21, 4  ;;  %v534_v16 = vrot.slane %v533_v10, 2 }
  0x4e   : > { %v547_v17 = vmax.f32 %v545_v5, %v546_v11  ;;  %v573_v19 = vsel %vm215_vm0, %v1054_v31, -inf  ;;  %v567_v22 = vrot.slane %v566_v18, 4  ;;  %v580_v27 = vsel %vm215_vm0, %v374_v45, -inf }
  0x4f   : > { %v541_v30 = vrot.slane %v540_v13, 2  ;;  %v554_v20 = vmax.f32 %v552_v12, %v553_v14  ;;  %v561_v41 = vmax.f32 %v559_v21, %v560_v15  ;;  %v535_v24 = vmax.f32 %v533_v10, %v534_v16 }
  0x50   : > { %v548_v25 = vrot.slane %v547_v17, 2  ;;  %v574_v26 = vrot.slane %v573_v19, 4  ;;  %v568_v36 = vmax.f32 %v566_v18, %v567_v22  ;;  %v581_v43 = vrot.slane %v580_v27, 4 }
  0x51   : > { %v542_v28 = vmax.f32 %v540_v13, %v541_v30  ;;  %v555_v29 = vrot.slane %v554_v20, 2  ;;  %v562_v23 = vrot.slane %v561_v41, 2  ;;  %v536_v33 = vrot.slane %v535_v24, 1 }
  0x52   : > { %v549_v37 = vmax.f32 %v547_v17, %v548_v25  ;;  %v575_v39 = vmax.f32 %v573_v19, %v574_v26  ;;  %v569_v62 = vrot.slane %v568_v36, 2  ;;  %v1148_v1 = vmax.f32 %v521_v52, %v522_v8 }
  0x53   : > { %v543_v47 = vrot.slane %v542_v28, 1  ;;  %v556_v56 = vmax.f32 %v554_v20, %v555_v29  ;;  %v563_v60 = vmax.f32 %v561_v41, %v562_v23  ;;  %v582_v5 = vmax.f32 %v580_v27, %v581_v43 }
  0x54   : > { %v550_v38 = vrot.slane %v549_v37, 1  ;;  %v576_v4 = vrot.slane %v575_v39, 2  ;;  %v1150_v31 = vmax.f32 %v528_v2, %v529_v32  ;;  %v570_v10 = vmax.f32 %v568_v36, %v569_v62 }
  0x55   : > { %v557_v45 = vrot.slane %v556_v56, 1  ;;  %v564_v9 = vrot.slane %v563_v60, 1  ;;  %v1152_v11 = vmax.f32 %v535_v24, %v536_v33  ;;  %v583_v21 = vrot.slane %v582_v5, 2 }
  0x56   : > { %v577_v12 = vmax.f32 %v575_v39, %v576_v4  ;;  %v587_v13 = vsel %vm215_vm0, %v1061_v35, -inf  ;;  %v1156_v14 = vmax.f32 %v542_v28, %v543_v47  ;;  %v1158_v15 = vmax.f32 %v549_v37, %v550_v38 }
  0x57   : > { %v571_v52 = vrot.slane %v570_v10, 1  ;;  %v588_v8 = vrot.slane %v587_v13, 4  ;;  %v1160_v16 = vmax.f32 %v556_v56, %v557_v45  ;;  %v584_v2 = vmax.f32 %v582_v5, %v583_v21 }
  0x58   : > { %v594_v32 = vsel %vm215_vm0, %v390_v49, -inf  ;;  %v601_v17 = vsel %vm215_vm0, %v1069_v42, -inf  ;;  %v1168_v18 = vmax.f32 %v563_v60, %v564_v9  ;;  %v578_v22 = vrot.slane %v577_v12, 1 }
  0x59   : > { %v589_v19 = vmax.f32 %v587_v13, %v588_v8  ;;  %v595_v30 = vrot.slane %v594_v32, 4  ;;  %v602_v20 = vrot.slane %v601_v17, 4  ;;  %v1170_v41 = vmax.f32 %v570_v10, %v571_v52 }
  0x5a   : > { %v608_v24 = vsel %vm215_vm0, %v391_v50, -inf  ;;  %v615_v35 = vsel %vm215_vm0, %v1064_v40, -inf  ;;  %v585_v28 = vrot.slane %v584_v2, 1  ;;  %v622_v23 = vsel %vm215_vm0, %v407_v51, -inf }
  0x5b   : > { %v590_v49 = vrot.slane %v589_v19, 2  ;;  %v596_v25 = vmax.f32 %v594_v32, %v595_v30  ;;  %v603_v26 = vmax.f32 %v601_v17, %v602_v20  ;;  %v609_v27 = vrot.slane %v608_v24, 4 }
  0x5c   : > { %v616_v29 = vrot.slane %v615_v35, 4  ;;  %v629_v36 = vsel %vm215_vm0, %v1077_v46, -inf  ;;  %v623_v43 = vrot.slane %v622_v23, 4  ;;  %v636_v56 = vsel %vm215_vm0, %v408_v53, -inf }
  0x5d   : > { %v591_v42 = vmax.f32 %v589_v19, %v590_v49  ;;  %v597_v33 = vrot.slane %v596_v25, 2  ;;  %v604_v50 = vrot.slane %v603_v26, 2  ;;  %v610_v37 = vmax.f32 %v608_v24, %v609_v27 }
  0x5e   : > { %v617_v39 = vmax.f32 %v615_v35, %v616_v29  ;;  %v630_v47 = vrot.slane %v629_v36, 4  ;;  %v624_v4 = vmax.f32 %v622_v23, %v623_v43  ;;  %v637_v45 = vrot.slane %v636_v56, 4 }
  0x5f   : > { %v592_v60 = vrot.slane %v591_v42, 1  ;;  %v598_v62 = vmax.f32 %v596_v25, %v597_v33  ;;  %v605_v40 = vmax.f32 %v603_v26, %v604_v50  ;;  %v611_v38 = vrot.slane %v610_v37, 2 }
  0x60   : > { %v618_v51 = vrot.slane %v617_v39, 2  ;;  %v631_v5 = vmax.f32 %v629_v36, %v630_v47  ;;  %v1188_v9 = vmax.f32 %v577_v12, %v578_v22  ;;  %v625_v8 = vrot.slane %v624_v4, 2 }
  0x61   : > { %v599_v10 = vrot.slane %v598_v62, 1  ;;  %v606_v21 = vrot.slane %v605_v40, 1  ;;  %v612_v13 = vmax.f32 %v610_v37, %v611_v38  ;;  %v638_v46 = vmax.f32 %v636_v56, %v637_v45 }
  0x62   : > { %v619_v52 = vmax.f32 %v617_v39, %v618_v51  ;;  %v632_v32 = vrot.slane %v631_v5, 2  ;;  %v1190_v17 = vmax.f32 %v584_v2, %v585_v28  ;;  %v1192_v53 = vmax.f32 %v591_v42, %v592_v60 }
  0x63   : > { %v613_v19 = vrot.slane %v612_v13, 1  ;;  %v643_v30 = vsel %vm215_vm0, %v1072_v44, -inf  ;;  %v626_v24 = vmax.f32 %v624_v4, %v625_v8  ;;  %v639_v22 = vrot.slane %v638_v46, 2 }
  0x64   : > { %v620_v20 = vrot.slane %v619_v52, 1  ;;  %v633_v12 = vmax.f32 %v631_v5, %v632_v32  ;;  %v1197_v35 = vmax.f32 %v598_v62, %v599_v10  ;;  %v644_v49 = vrot.slane %v643_v30, 4 }
  0x65   : > { %v650_v2 = vsel %vm215_vm0, %v424_v55, -inf  ;;  %v657_v25 = vsel %vm215_vm0, %v1092_v54, -inf  ;;  %v1205_v26 = vmax.f32 %v605_v40, %v606_v21  ;;  %v1207_v27 = vmax.f32 %v612_v13, %v613_v19 }
  0x66   : > { %v627_v28 = vrot.slane %v626_v24, 1  ;;  %v634_v29 = vrot.slane %v633_v12, 1  ;;  %v645_v23 = vmax.f32 %v643_v30, %v644_v49  ;;  %v651_v36 = vrot.slane %v650_v2, 4 }
  0x67   : > { %v658_v42 = vrot.slane %v657_v25, 4  ;;  %v664_v44 = vsel %vm215_vm0, %v425_v34, -inf  ;;  %v1219_v55 = vmax.f32 %v619_v52, %v620_v20  ;;  %v1223_v50 = vmax.f32 %v638_v46, %v639_v22 }
  0x68   : > { %v1221_v33 = vmax.f32 %v626_v24, %v627_v28  ;;  %v665_v37 = vrot.slane %v664_v44, 4  ;;  %v646_v39 = vrot.slane %v645_v23, 2  ;;  %v652_v43 = vmax.f32 %v650_v2, %v651_v36 }
  0x69   : > { %v659_v54 = vmax.f32 %v657_v25, %v658_v42  ;;  %v671_v34 = vsel %vm215_vm0, %v1080_v48, -inf  ;;  %v1227_v47 = vmax.f32 %v633_v12, %v634_v29  ;;  %v678_v62 = vsel %vm215_vm0, %v441_v61, -inf }
  0x6a   : > { %v666_v56 = vmax.f32 %v664_v44, %v665_v37  ;;  %v672_v60 = vrot.slane %v671_v34, 4  ;;  %v647_v40 = vmax.f32 %v645_v23, %v646_v39  ;;  %v653_v38 = vrot.slane %v652_v43, 2 }
  0x6b   : > { %v660_v51 = vrot.slane %v659_v54, 2  ;;  %v679_v4 = vrot.slane %v678_v62, 4  ;;  %v685_v10 = vsel %vm215_vm0, %v1097_v57, -inf  ;;  %v692_v48 = vsel %vm215_vm0, %v442_v58, -inf }
  0x6c   : > { %v667_v5 = vrot.slane %v666_v56, 2  ;;  %v673_v45 = vmax.f32 %v671_v34, %v672_v60  ;;  %v648_v61 = vrot.slane %v647_v40, 1  ;;  %v654_v21 = vmax.f32 %v652_v43, %v653_v38 }
  0x6d   : > { %v661_v13 = vmax.f32 %v659_v54, %v660_v51  ;;  %v680_v52 = vmax.f32 %v678_v62, %v679_v4  ;;  %v686_v46 = vrot.slane %v685_v10, 4  ;;  %v693_v19 = vrot.slane %v692_v48, 4 }
  0x6e   : > { %v668_v8 = vmax.f32 %v666_v56, %v667_v5  ;;  %v674_v32 = vrot.slane %v673_v45, 2  ;;  %v641_v30 = vrot.slane %v1223_v50, 1  ;;  %v655_v20 = vrot.slane %v654_v21, 1 }
  0x6f   : > { %v662_v24 = vrot.slane %v661_v13, 1  ;;  %v681_v12 = vrot.slane %v680_v52, 2  ;;  %v687_v58 = vmax.f32 %v685_v10, %v686_v46  ;;  %v694_v49 = vmax.f32 %v692_v48, %v693_v19 }
  0x70   : > { %v669_v57 = vrot.slane %v668_v8, 1  ;;  %v675_v22 = vmax.f32 %v673_v45, %v674_v32  ;;  %v649_v2 = vmax.f32 %v647_v40, %v648_v61  ;;  %v656_v25 = vmax.f32 %v654_v21, %v655_v20 }
  0x71   : > { %v682_v28 = vmax.f32 %v680_v52, %v681_v12  ;;  %v732_v29 = vsel %vm731_vm1, %v1116_v63, %v1112_v59  ;;  %v663_v23 = vmax.f32 %v661_v13, %v662_v24  ;;  %v688_v42 = vrot.slane %v687_v58, 2 }
  0x72   : > { %v676_v36 = vrot.slane %v675_v22, 1  ;;  %v695_v44 = vrot.slane %v694_v49, 2  ;;  %v670_v37 = vmax.f32 %v668_v8, %v669_v57  ;;  %v734_v39 = vsel %vm733_vm2, %v1118_v0, %v732_v29 }
  0x73   : > { %v745_v43 = vsel %vm731_vm1, %v1156_v14, %v1152_v11  ;;  %v752_v54 = vsel %vm731_vm1, %v1197_v35, %v1192_v53  ;;  %v683_v34 = vrot.slane %v682_v28, 1  ;;  %v689_v56 = vmax.f32 %v687_v58, %v688_v42 }
  0x74   : > { %v696_v59 = vmax.f32 %v694_v49, %v695_v44  ;;  %v736_v63 = vsel %vm735_vm3, %v1120_v3, %v734_v39  ;;  %v677_v60 = vmax.f32 %v675_v22, %v676_v36  ;;  %v746_v0 = vsel %vm733_vm2, %v1158_v15, %v745_v43 }
  0x75   : > { %v738_v62 = vsel %vm737_vm4, %v1128_v6, %v736_v63  ;;  %v753_v11 = vsel %vm733_vm2, %v1205_v26, %v752_v54  ;;  %v690_v14 = vrot.slane %v689_v56, 1  ;;  %v747_v3 = vsel %vm735_vm3, %v1160_v16, %v746_v0 }
  0x76   : > { %v697_v53 = vrot.slane %v696_v59, 1  ;;  %v740_v35 = vsel %vm739_vm5, %v1130_v7, %v738_v62  ;;  %v748_v15 = vsel %vm737_vm4, %v1168_v18, %v747_v3  ;;  %v754_v26 = vsel %vm735_vm3, %v1207_v27, %v753_v11 }
  0x77   : > { %v742_v6 = vsel %vm741_vm6, %v1148_v1, %v740_v35  ;;  %v759_v40 = vsel %vm731_vm1, %v656_v25, %v649_v2  ;;  %v642_v38 = vmax.f32 %v1223_v50, %v641_v30  ;;  %v684_v51 = vmax.f32 %v682_v28, %v683_v34 }
  0x78   : > { %v744_v7 = vsel %vm743_vm7, %v1150_v31, %v742_v6  ;;  %v749_v16 = vsel %vm739_vm5, %v1170_v41, %v748_v15  ;;  %v691_v4 = vmax.f32 %v689_v56, %v690_v14  ;;  %v755_v18 = vsel %vm737_vm4, %v1219_v55, %v754_v26 }
  0x79   : > { %v750_v1 = vsel %vm741_vm6, %v1188_v9, %v749_v16  ;;  %v760_v27 = vsel %vm733_vm2, %v663_v23, %v759_v40  ;;  %770 = vst [vmem:[%s211_s20] sm:$0xff] %v744_v7  ;;  %v698_v5 = vmax.f32 %v696_v59, %v697_v53  ;;  %v756_v31 = vsel %vm739_vm5, %v1221_v33, %v755_v18 }
  0x7a   : > { %v751_v50 = vsel %vm743_vm7, %v1190_v17, %v750_v1  ;;  %v761_v45 = vsel %vm735_vm3, %v670_v37, %v760_v27  ;;  %v757_v41 = vsel %vm741_vm6, %v1227_v47, %v756_v31 }
  0x7b   : > { %v762_v9 = vsel %vm737_vm4, %v677_v60, %v761_v45  ;;  %771 = vst [vmem:[%s211_s20 + $0x8] sm:$0xff] %v751_v50  ;;  %v758_v55 = vsel %vm743_vm7, %v642_v38, %v757_v41 }
  0x7c   : > { %v763_v10 = vsel %vm739_vm5, %v684_v51, %v762_v9  ;;  %772 = vst [vmem:[%s211_s20 + $0x10] sm:$0xff] %v758_v55 }
  0x7d   : > { %v764_v48 = vsel %vm741_vm6, %v691_v4, %v763_v10 }
  0x7e   : > { %v765_v17 = vsel %vm743_vm7, %v698_v5, %v764_v48 }
  0x7f   : > { %773 = vst [vmem:[%s211_s20 + $0x18] sm:$0xff] %v765_v17 }
  0x80 PF: > { %s13_s16 = sadd.s32 1, %s962_s16   ;;  %s1320_s12 = smov %s954_s14 }
  0x81   : > { %p10_p8 = scmp.ge.s32.totalorder %s13_s16, 6   ;;  %s1321_s13 = smov %s958_s15 }
  0x82   : > { %s1322_s14 = smov %s1325_s17  ;;  %s1323_s15 = smov %s1329_s18 }
  0x83   :  { %12 = sbr.rel (!%p10_p8) target bundleno = 3 (0x3), region = 62 }

// kernel: conv_block_forward.2
= control target key start
LH: loop header
LB: loop body
LE: loop exit
PB: predicated region body
PF: predicated region fallthrough
CT: control target
= control target key end

     0   :  { %s4453_s21 = smov 0   ;;  %s5826_s0 = inlined_call_operand.vmem [shape: bf16[2,18,18,8], index: 0, kind: input, shape index: {}]   ;;  %s5827_s1 = inlined_call_operand.vmem [shape: bf16[9,8,128], index: 1, kind: input, shape index: {}]   ;;  %s5828_s2 = inlined_call_operand.vmem [shape: bf16[2,1,32], index: 2, kind: input, shape index: {}]   ;;  %s5829_s3 = inlined_call_operand.vmem [shape: bf16[32,128], index: 3, kind: input, shape index: {}]   ;;  %s5830_s4 = inlined_call_operand.vmem [shape: f32[2,128], index: 4, kind: input, shape index: {}]   ;;  %s5831_s5 = inlined_call_operand.vmem [shape: f32[2,16,16,128], index: 5, kind: output, shape index: {0}]   ;;  %s5832_s6 = inlined_call_operand.vmem [shape: f32[2,2,128], index: 6, kind: output, shape index: {1}]  }
   0x1 LB: > { %s3395_s22 = sadd.s32 4294967295, %s4414_s21   ;;  %p3399_p0 = scmp.ge.s32.totalorder %s4414_s21, 1  ;;  %s4414_s21 = sphi %s4453_s21, %s17_s21  }
   0x2   : > { %p223_p1 = scmp.lt.s32.totalorder %s4414_s21, 3 }
   0x4   : > { %p224_p2 = pnand %p3399_p0, %p223_p1 }
   0x6   : > { %227 = sbr.rel (%p224_p2) target bundleno = 629 (0x275), region = 40 }
   0xd   : > { %v3404_v0 = vld [vmem:[%s5827_s1 + $0x4] sm:$0xf]  ;;  %vm819_vm0 = vcmask 1043456   ;;  %v3536_v1 = vld [vmem:[%s5827_s1 + $0x10] sm:$0xf]  ;;  %p260_p3 = scmp.lt.s32.totalorder %s3395_s22, 1 }
   0xe   : > { %4363 = vmatprep.subr.msk.bf16.mxu1 %vm819_vm0, %v3404_v0  ;;  %v821_v2 = vsel %vm819_vm0, %v3404_v0, 0  ;;  %4367 = vmatprep.subr.msk.bf16.mxu0 %vm819_vm0, %v3536_v1  ;;  %v4471_v3 = vsel %vm819_vm0, %v3536_v1, 0  ;;  %v332_v4 = vld [vmem:[%s5827_s1] sm:$0xf]  ;;  %v3555_v5 = vld [vmem:[%s5827_s1 + $0x14] sm:$0xf] }
   0xf   : > { %5860 = vst [vmem:[#allocation2_spill] sm:$0xff] %v4471_v3  ;;  %3792 = vmatpush3.bf16.msra.mxu1 %v821_v2  ;;  %3928 = vmatpush3.bf16.msra.mxu0 %v4471_v3  ;;  %s5909_s22 = smov (!%p260_p3, %s3395_s22), 1  ;;  %vm333_vm1 = vsmask.f32 3328  ;;  %vm334_vm2 = vsmask.f32 7440 }
  0x10   : > { %4364 = vmatprep.subr.msk.bf16.mxu1 %vm819_vm0, %v332_v4  ;;  %4369 = vmatprep.subr.msk.bf16.mxu0 %vm819_vm0, %v3555_v5  ;;  %s4373_s7 = smul.u32 216, %s5909_s22  ;;  %v4491_v6 = vsel %vm819_vm0, %v332_v4, 0  ;;  %v4494_v7 = vsel %vm819_vm0, %v3555_v5, 0  ;;  %v4499_v8 = vld [vmem:[%s5827_s1 + $0x18] sm:$0xf]  ;;  %vm770_vm3 = vcmask 64512   ;;  %vm4535_vm4 = vmor %vm333_vm1, %vm334_vm2 }
  0x11   : > { %v4523_v20 = vsel %vm819_vm0, %v4499_v8, 0  ;;  %vm1292_vm5 = vcmask 1042432   ;;  %vm1293_vm6 = vcmask 1046532   ;;  %v4402_v34 = vld [vmem:[%s5829_s3] sm:$0xff]   ;;  %vm4417_vm8 = vmmov 0   ;;  %s3634_s12 = sshll.u32 %s5909_s22, 8 }
  0x12   : > { %s4488_s10 = scalar_lea.vmem %s5826_s0, %s4373_s7  ;;  %vm4764_vm7 = vmor %vm1292_vm5, %vm1293_vm6  ;;  %s267_s7 = scalar_lea.vmem %s5828_s2, %s5909_s22  ;;  %vm3080_vm9 = vcmask 261120  }
  0x13   : > { %v4502_v9 = vld [vmem:[%s4488_s10] sm:$0xf]  ;;  %v4505_v10 = vld [vmem:[%s4488_s10 + $0x4] sm:$0xf]  ;;  %v280_v11 = vld [vmem:[%s4488_s10 + $0x8] sm:$0x1]  ;;  %s5567_s15 = scalar_lea.vmem %s5831_s5, %s3634_s12 }
  0x14   : > { %v337_v12 = vshrl.u32 %v4502_v9, 16  ;;  %v340_v13 = vshll.u32 %v4502_v9, 16  ;;  %v346_v14 = vshll.u32 %v4505_v10, 16  ;;  %v350_v15 = vshrl.u32 %v4505_v10, 16  ;;  %v4513_v16 = vld [vmem:[%s4488_s10 + $0xc] sm:$0xf] }
  0x15   : > { %v356_v17 = vshll.u32 %v280_v11, 16  ;;  %v4516_v18 = vld [vmem:[%s4488_s10 + $0x10] sm:$0xf]  ;;  %v4519_v19 = vld [vmem:[%s4488_s10 + $0x14] sm:$0x1]  ;;  %v361_v26 = vshrl.u32 %v4513_v16, 16 }
  0x16   : > { %v339_v21 = vrot.slane %v337_v12, 4  ;;  %v342_v22 = vrot.slane %v340_v13, 5  ;;  %v348_v23 = vrot.slane %v346_v14, 5  ;;  %v352_v24 = vrot.slane %v350_v15, 4  ;;  %v4531_v33 = vld [vmem:[%s4488_s10 + $0x18] sm:$0xf] }
  0x17   : > { %v358_v25 = vrot.slane %v356_v17, 5  ;;  %v364_v27 = vshll.u32 %v4513_v16, 16  ;;  %v370_v28 = vshll.u32 %v4516_v18, 16  ;;  %v374_v31 = vshrl.u32 %v4516_v18, 16  ;;  %v4544_v39 = vld [vmem:[%s4488_s10 + $0x1c] sm:$0xf] }
  0x18   : > { %v343_v29 = vor.u32 %v342_v22, %v339_v21  ;;  %v353_v30 = vor.u32 %v352_v24, %v348_v23  ;;  %v380_v32 = vshll.u32 %v4519_v19, 16  ;;  %v363_v35 = vrot.slane %v361_v26, 4  ;;  %v4548_v46 = vld [vmem:[%s4488_s10 + $0x20] sm:$0x1]  ;;  %v4558_v57 = vld [vmem:[%s4488_s10 + $0x24] sm:$0xf] }
  0x19   : > { %v366_v36 = vrot.slane %v364_v27, 5  ;;  %v372_v37 = vrot.slane %v370_v28, 5  ;;  %v4541_v38 = vcombine.low %v4513_v16, %v4516_v18  ;;  %v376_v42 = vrot.slane %v374_v31, 4  ;;  %v4563_v62 = vld [vmem:[%s4488_s10 + $0x28] sm:$0xf]  ;;  %s3403_s16 = sshll.u32 %s5909_s22, 1 }
  0x1a   : > { %v344_v40 = vrot.slane %v343_v29, 4  ;;  %v354_v41 = vrot.slane %v353_v30, 4  ;;  %v382_v43 = vrot.slane %v380_v32, 5  ;;  %v385_v47 = vshrl.u32 %v4531_v33, 16  ;;  %v4571_v4 = vld [vmem:[%s4488_s10 + $0x2c] sm:$0x1]  ;;  %s276_s19 = scalar_lea.vmem %s5832_s6, %s3403_s16 }
  0x1b   : > { %v367_v44 = vor.u32 %v366_v36, %v363_v35  ;;  %v388_v48 = vshll.u32 %v4531_v33, 16  ;;  %v377_v51 = vor.u32 %v376_v42, %v372_v37  ;;  %v394_v52 = vshll.u32 %v4544_v39, 16  ;;  %v4577_v14 = vld [vmem:[%s4488_s10 + $0x30] sm:$0xf]  ;;  %v4589_v28 = vld [vmem:[%s4488_s10 + $0x34] sm:$0xf] }
  0x1c   : > { %v349_v49 = vsel %vm4535_vm4, %v344_v40, %v348_v23  ;;  %v359_v50 = vsel %vm4535_vm4, %v354_v41, %v358_v25  ;;  %v387_v55 = vrot.slane %v385_v47, 4  ;;  %v398_v60 = vshrl.u32 %v4544_v39, 16  ;;  %v4584_v23 = vld [vmem:[%s5827_s1 + $0x8] sm:$0xf]  ;;  %v4596_v32 = vld [vmem:[%s4488_s10 + $0x38] sm:$0x1] }
  0x1d   : > { %v3405_v53 = vcombine.low %v349_v49, %v359_v50  ;;  %v368_v54 = vrot.slane %v367_v44, 4  ;;  %v390_v56 = vrot.slane %v388_v48, 5  ;;  %v378_v58 = vrot.slane %v377_v51, 4  ;;  %v4604_v48 = vld [vmem:[%s4488_s10 + $0x3c] sm:$0xf] }
  0x1e   : > { %v396_v59 = vrot.slane %v394_v52, 5  ;;  %v404_v61 = vshll.u32 %v4548_v46, 16  ;;  %v400_v11 = vrot.slane %v398_v60, 4  ;;  %v409_v13 = vshrl.u32 %v4558_v57, 16  ;;  %v4612_v52 = vld [vmem:[%s4488_s10 + $0x40] sm:$0xf] }
  0x1f   : > { %3793 = vmatprep.mubr.msk.bf16.mxu1 %vm770_vm3, %v3405_v53  ;;  %v373_v63 = vsel %vm4535_vm4, %v368_v54, %v372_v37  ;;  %v391_v0 = vor.u32 %v390_v56, %v387_v55  ;;  %v383_v5 = vsel %vm4535_vm4, %v378_v58, %v382_v43  ;;  %v412_v21 = vshll.u32 %v4558_v57, 16  ;;  %v4742_v1 = vld [vmem:[%s4488_s10 + $0x80] sm:$0x1] }
  0x20   : > { %v406_v12 = vrot.slane %v404_v61, 5  ;;  %v3406_v15 = vcombine.low %v373_v63, %v383_v5  ;;  %v418_v22 = vshll.u32 %v4563_v62, 16  ;;  %v401_v24 = vor.u32 %v400_v11, %v396_v59  ;;  %v4624_v5 = vld [vmem:[%s4488_s10 + $0x44] sm:$0x1] }
  0x21   : > { %v392_v17 = vrot.slane %v391_v0, 4  ;;  %v411_v25 = vrot.slane %v409_v13, 4  ;;  %v422_v26 = vshrl.u32 %v4563_v62, 16  ;;  %v428_v27 = vshll.u32 %v4571_v4, 16  ;;  %v4629_v13 = vld [vmem:[%s4488_s10 + $0x48] sm:$0xf] }
  0x22   : > { %3929 = vmatprep.mubr.msk.bf16.mxu0 %vm770_vm3, %v3406_v15  ;;  %3794 = vmatmul.mubr.msk.bf16.vlgmr.msra.gmra.mrb[0].mxu1 %vm770_vm3, %v3406_v15  ;;  %v414_v30 = vrot.slane %v412_v21, 5  ;;  %v420_v31 = vrot.slane %v418_v22, 5  ;;  %v433_v35 = vshrl.u32 %v4577_v14, 16  ;;  %v402_v36 = vrot.slane %v401_v24, 4  ;;  %v4635_v24 = vld [vmem:[%s4488_s10 + $0x4c] sm:$0xf] }
  0x23   : > { %v397_v29 = vsel %vm4535_vm4, %v392_v17, %v396_v59  ;;  %3826 = vmatpush3.bf16.msra.mxu1 %v4491_v6  ;;  %v424_v37 = vrot.slane %v422_v26, 4  ;;  %v430_v40 = vrot.slane %v428_v27, 5  ;;  %v436_v41 = vshll.u32 %v4577_v14, 16 }
  0x24   : > { %v415_v42 = vor.u32 %v414_v30, %v411_v25  ;;  %v435_v43 = vrot.slane %v433_v35, 4  ;;  %v442_v44 = vshll.u32 %v4589_v28, 16  ;;  %v446_v47 = vshrl.u32 %v4589_v28, 16  ;;  %4365 = vmatprep.subr.msk.bf16.mxu1 %vm819_vm0, %v4584_v23 }
  0x25   : > { %v407_v49 = vsel %vm4535_vm4, %v402_v36, %v406_v12  ;;  %v425_v6 = vor.u32 %v424_v37, %v420_v31  ;;  %v438_v50 = vrot.slane %v436_v41, 5  ;;  %v452_v51 = vshll.u32 %v4596_v32, 16 }
  0x26   : > { %v4614_v53 = vcombine.low %v397_v29, %v407_v49  ;;  %v416_v54 = vrot.slane %v415_v42, 4  ;;  %v444_v55 = vrot.slane %v442_v44, 5  ;;  %v448_v56 = vrot.slane %v446_v47, 4  ;;  %v4658_v42 = vld [vmem:[%s4488_s10 + $0x54] sm:$0xf] }
  0x27   : > { %v426_v58 = vrot.slane %v425_v6, 4  ;;  %v439_v59 = vor.u32 %v438_v50, %v435_v43  ;;  %v454_v60 = vrot.slane %v452_v51, 5  ;;  %v457_v61 = vshrl.u32 %v4604_v48, 16  ;;  %v4663_v6 = vld [vmem:[%s4488_s10 + $0x58] sm:$0xf] }
  0x28   : > { %5863 = vst [vmem:[#allocation3_spill] sm:$0xff] %v4614_v53  ;;  %3930 = vmatmul.mubr.msk.bf16.vlgmr.msra.gmra.mrb[0].mxu0 %vm770_vm3, %v4614_v53  ;;  %3797 = vmatprep.mubr.msk.bf16.mxu1 %vm770_vm3, %v4614_v53  ;;  %v421_v63 = vsel %vm4535_vm4, %v416_v54, %v420_v31  ;;  %v449_v0 = vor.u32 %v448_v56, %v444_v55  ;;  %v460_v11 = vshll.u32 %v4604_v48, 16  ;;  %v466_v12 = vshll.u32 %v4612_v52, 16  ;;  %v4888_v53 = vld [vmem:[%s4488_s10 + $0xac] sm:$0xf] }
  0x29   : > { %v431_v15 = vsel %vm4535_vm4, %v426_v58, %v430_v40  ;;  %v440_v17 = vrot.slane %v439_v59, 4  ;;  %v459_v21 = vrot.slane %v457_v61, 4  ;;  %v470_v22 = vshrl.u32 %v4612_v52, 16  ;;  %3962 = vmatpush3.bf16.msra.mxu0 %v4494_v7 }
  0x2a   : > { %v4638_v25 = vcombine.low %v421_v63, %v431_v15  ;;  %v450_v26 = vrot.slane %v449_v0, 4  ;;  %v462_v27 = vrot.slane %v460_v11, 5  ;;  %v468_v29 = vrot.slane %v466_v12, 5  ;;  %4370 = vmatprep.subr.msk.bf16.mxu0 %vm819_vm0, %v4499_v8  ;;  %v4653_v8 = vld [vmem:[%s4488_s10 + $0x50] sm:$0x1] }
  0x2b   : > { %v445_v30 = vsel %vm4535_vm4, %v440_v17, %v444_v55  ;;  %v472_v31 = vrot.slane %v470_v22, 4  ;;  %v476_v35 = vshll.u32 %v4624_v5, 16  ;;  %v481_v36 = vshrl.u32 %v4629_v13, 16  ;;  %v4676_v11 = vld [vmem:[%s4488_s10 + $0x5c] sm:$0x1] }
  0x2c   : > { %5864 = vst [vmem:[#allocation4_spill] sm:$0xff] %v4638_v25  ;;  %3933 = vmatprep.mubr.msk.bf16.mxu0 %vm770_vm3, %v4638_v25  ;;  %3798 = vmatmul.mubr.msk.bf16.gmra.mrb[4].mxu1 %vm770_vm3, %v4638_v25  ;;  %v455_v7 = vsel %vm4535_vm4, %v450_v26, %v454_v60  ;;  %v463_v37 = vor.u32 %v462_v27, %v459_v21  ;;  %v484_v40 = vshll.u32 %v4629_v13, 16  ;;  %v490_v41 = vshll.u32 %v4635_v24, 16  ;;  %v4680_v15 = vld [vmem:[%s4488_s10 + $0x60] sm:$0xf] }
  0x2d   : > { %v4660_v43 = vcombine.low %v445_v30, %v455_v7  ;;  %v473_v44 = vor.u32 %v472_v31, %v468_v29  ;;  %v478_v47 = vrot.slane %v476_v35, 5  ;;  %v483_v49 = vrot.slane %v481_v36, 4  ;;  %v4685_v27 = vld [vmem:[%s4488_s10 + $0x64] sm:$0xf] }
  0x2e   : > { %v464_v50 = vrot.slane %v463_v37, 4  ;;  %v486_v51 = vrot.slane %v484_v40, 5  ;;  %v492_v54 = vrot.slane %v490_v41, 5  ;;  %v494_v55 = vshrl.u32 %v4635_v24, 16 }
  0x2f   : > { %5865 = vst [vmem:[#allocation5_spill] sm:$0xff] %v4660_v43  ;;  %3801 = vmatprep.mubr.msk.bf16.mxu1 %vm770_vm3, %v4660_v43  ;;  %v474_v56 = vrot.slane %v473_v44, 4  ;;  %v500_v58 = vshll.u32 %v4653_v8, 16  ;;  %v505_v59 = vshrl.u32 %v4658_v42, 16  ;;  %v508_v60 = vshll.u32 %v4658_v42, 16 }
  0x30   : > { %3934 = vmatmul.mubr.msk.bf16.gmra.mrb[4].mxu0 %vm770_vm3, %v4660_v43  ;;  %v469_v61 = vsel %vm4535_vm4, %v464_v50, %v468_v29  ;;  %v487_v63 = vor.u32 %v486_v51, %v483_v49  ;;  %v496_v0 = vrot.slane %v494_v55, 4  ;;  %v514_v12 = vshll.u32 %v4663_v6, 16 }
  0x31   : > { %v479_v17 = vsel %vm4535_vm4, %v474_v56, %v478_v47  ;;  %v502_v21 = vrot.slane %v500_v58, 5  ;;  %v507_v22 = vrot.slane %v505_v59, 4  ;;  %v510_v26 = vrot.slane %v508_v60, 5  ;;  %v4699_v47 = vld [vmem:[%s4488_s10 + $0x68] sm:$0x1] }
  0x32   : > { %v4687_v30 = vcombine.low %v469_v61, %v479_v17  ;;  %v488_v29 = vrot.slane %v487_v63, 4  ;;  %v497_v31 = vor.u32 %v496_v0, %v492_v54  ;;  %v516_v35 = vrot.slane %v514_v12, 5  ;;  %v4704_v59 = vld [vmem:[%s4488_s10 + $0x6c] sm:$0xf]  ;;  %v4710_v0 = vld [vmem:[%s4488_s10 + $0x70] sm:$0xf] }
  0x33   : > { %v511_v36 = vor.u32 %v510_v26, %v507_v22  ;;  %v518_v7 = vshrl.u32 %v4663_v6, 16  ;;  %v524_v37 = vshll.u32 %v4676_v11, 16  ;;  %v529_v40 = vshrl.u32 %v4680_v15, 16 }
  0x34   : > { %5866 = vst [vmem:[#allocation6_spill] sm:$0xff] %v4687_v30  ;;  %3937 = vmatprep.mubr.msk.bf16.mxu0 %vm770_vm3, %v4687_v30  ;;  %3802 = vmatmul.mubr.msk.bf16.gmra.mrb[8].mxu1 %vm770_vm3, %v4687_v30  ;;  %v493_v41 = vsel %vm4535_vm4, %v488_v29, %v492_v54  ;;  %v498_v44 = vrot.slane %v497_v31, 4  ;;  %v532_v49 = vshll.u32 %v4680_v15, 16  ;;  %v538_v50 = vshll.u32 %v4685_v27, 16 }
  0x35   : > { %v512_v51 = vrot.slane %v511_v36, 4  ;;  %v520_v55 = vrot.slane %v518_v7, 4  ;;  %v526_v56 = vrot.slane %v524_v37, 5  ;;  %v531_v58 = vrot.slane %v529_v40, 4  ;;  %v4718_v36 = vld [vmem:[%s4488_s10 + $0x74] sm:$0x1] }
  0x36   : > { %v503_v54 = vsel %vm4535_vm4, %v498_v44, %v502_v21  ;;  %v534_v60 = vrot.slane %v532_v49, 5  ;;  %v540_v61 = vrot.slane %v538_v50, 5  ;;  %v542_v63 = vshrl.u32 %v4685_v27, 16 }
  0x37   : > { %v4712_v12 = vcombine.low %v493_v41, %v503_v54  ;;  %v517_v17 = vsel %vm4535_vm4, %v512_v51, %v516_v35  ;;  %v521_v22 = vor.u32 %v520_v55, %v516_v35  ;;  %v548_v26 = vshll.u32 %v4699_v47, 16  ;;  %v4729_v55 = vld [vmem:[%s4488_s10 + $0x78] sm:$0xf] }
  0x38   : > { %v535_v29 = vor.u32 %v534_v60, %v531_v58  ;;  %v544_v31 = vrot.slane %v542_v63, 4  ;;  %v553_v21 = vshrl.u32 %v4704_v59, 16  ;;  %v556_v7 = vshll.u32 %v4704_v59, 16 }
  0x39   : > { %5867 = vst [vmem:[#allocation7_spill] sm:$0xff] %v4712_v12  ;;  %3938 = vmatmul.mubr.msk.bf16.gmra.mrb[8].mxu0 %vm770_vm3, %v4712_v12  ;;  %3805 = vmatprep.mubr.msk.bf16.mxu1 %vm770_vm3, %v4712_v12  ;;  %v522_v37 = vrot.slane %v521_v22, 4  ;;  %v550_v35 = vrot.slane %v548_v26, 5  ;;  %v562_v40 = vshll.u32 %v4710_v0, 16  ;;  %v566_v41 = vshrl.u32 %v4710_v0, 16 }
  0x3a   : > { %v536_v44 = vrot.slane %v535_v29, 4  ;;  %v545_v49 = vor.u32 %v544_v31, %v540_v61  ;;  %v555_v50 = vrot.slane %v553_v21, 4  ;;  %v558_v51 = vrot.slane %v556_v7, 5  ;;  %v4735_v22 = vld [vmem:[%s4488_s10 + $0x7c] sm:$0xf] }
  0x3b   : > { %v527_v58 = vsel %vm4535_vm4, %v522_v37, %v526_v56  ;;  %v564_v54 = vrot.slane %v562_v40, 5  ;;  %v568_v60 = vrot.slane %v566_v41, 4  ;;  %v572_v63 = vshll.u32 %v4718_v36, 16 }
  0x3c   : > { %v4737_v26 = vcombine.low %v517_v17, %v527_v58  ;;  %v541_v29 = vsel %vm4535_vm4, %v536_v44, %v540_v61  ;;  %v546_v2 = vrot.slane %v545_v49, 4  ;;  %v559_v31 = vor.u32 %v558_v51, %v555_v50  ;;  %v4757_v58 = vld [vmem:[%s4488_s10 + $0x84] sm:$0xf] }
  0x3d   : > { %v569_v21 = vor.u32 %v568_v60, %v564_v54  ;;  %v574_v7 = vrot.slane %v572_v63, 5  ;;  %v577_v56 = vshrl.u32 %v4729_v55, 16  ;;  %v580_v37 = vshll.u32 %v4729_v55, 16 }
  0x3e   : > { %5868 = vst [vmem:[#allocation8_spill] sm:$0xff] %v4737_v26  ;;  %3941 = vmatprep.mubr.msk.bf16.mxu0 %vm770_vm3, %v4737_v26  ;;  %3806 = vmatmul.mubr.msk.bf16.gmra.mrb[12].mxu1 %vm770_vm3, %v4737_v26  ;;  %v551_v61 = vsel %vm4535_vm4, %v546_v2, %v550_v35  ;;  %v560_v17 = vrot.slane %v559_v31, 4  ;;  %v586_v40 = vshll.u32 %v4735_v22, 16  ;;  %v590_v41 = vshrl.u32 %v4735_v22, 16 }
  0x3f   : > { %v4754_v44 = vcombine.low %v541_v29, %v551_v61  ;;  %v570_v49 = vrot.slane %v569_v21, 4  ;;  %v579_v50 = vrot.slane %v577_v56, 4  ;;  %v582_v51 = vrot.slane %v580_v37, 5  ;;  %v4777_v56 = vld [vmem:[%s4488_s10 + $0x88] sm:$0xf] }
  0x40   : > { %v565_v60 = vsel %vm4535_vm4, %v560_v17, %v564_v54  ;;  %v588_v63 = vrot.slane %v586_v40, 5  ;;  %v592_v45 = vrot.slane %v590_v41, 4  ;;  %v596_v2 = vshll.u32 %v4742_v1, 16  ;;  %v4782_v40 = vld [vmem:[%s4488_s10 + $0x8c] sm:$0x1] }
  0x41   : > { %5869 = vst [vmem:[#allocation9_spill] sm:$0xff] %v4754_v44  ;;  %3942 = vmatmul.mubr.msk.bf16.gmra.mrb[12].mxu0 %vm770_vm3, %v4754_v44  ;;  %3809 = vmatprep.mubr.msk.bf16.mxu1 %vm770_vm3, %v4754_v44  ;;  %v575_v29 = vsel %vm4535_vm4, %v570_v49, %v574_v7  ;;  %v583_v54 = vor.u32 %v582_v51, %v579_v50  ;;  %v3470_v31 = vrot.slane %v4513_v16, 9  ;;  %v1304_v21 = vrot.slane %v4516_v18, 5 }
  0x42   : > { %v4779_v37 = vcombine.low %v565_v60, %v575_v29  ;;  %v593_v61 = vor.u32 %v592_v45, %v588_v63  ;;  %v598_v17 = vrot.slane %v596_v2, 5  ;;  %v601_v41 = vshrl.u32 %v4757_v58, 16 }
  0x43   : > { %v584_v3 = vrot.slane %v583_v54, 4  ;;  %v1305_v7 = vsel %vm4764_vm7, %v3470_v31, %v1304_v21  ;;  %v1306_v49 = vrot.slane %v1304_v21, 4  ;;  %v604_v16 = vshll.u32 %v4757_v58, 16  ;;  %v4800_v21 = vld [vmem:[%s4488_s10 + $0x90] sm:$0xf] }
  0x44   : > { %5872 = vst [vmem:[#allocation10_spill] sm:$0xff] %v4779_v37  ;;  %3945 = vmatprep.mubr.msk.bf16.mxu0 %vm770_vm3, %v4779_v37  ;;  %v594_v18 = vrot.slane %v593_v61, 4  ;;  %v603_v50 = vrot.slane %v601_v41, 4  ;;  %v610_v45 = vshll.u32 %v4777_v56, 16  ;;  %v614_v51 = vshrl.u32 %v4777_v56, 16 }
  0x45   : > { %v589_v60 = vsel %vm4535_vm4, %v584_v3, %v588_v63  ;;  %v5873_v2 = vrot.slane %v4519_v19, 5  ;;  %v606_v54 = vrot.slane %v604_v16, 5  ;;  %v620_v31 = vshll.u32 %v4782_v40, 16  ;;  %v4809_v19 = vld [vmem:[%s4488_s10 + $0x94] sm:$0xf] }
  0x46   : > { %3810 = vmatmul.mubr.msk.bf16.gmra.mrb[16].mxu1 %vm770_vm3, %v4779_v37  ;;  %v599_v61 = vsel %vm4535_vm4, %v594_v18, %v598_v17  ;;  %v612_v3 = vrot.slane %v610_v45, 5  ;;  %v616_v63 = vrot.slane %v614_v51, 4  ;;  %v5876_v12 = vrot.slane %v4544_v39, 5  ;;  %v4827_v45 = vld [vmem:[%s4488_s10 + $0x98] sm:$0x1] }
  0x47   : > { %v1308_v29 = vsel %vm4764_vm7, %v1306_v49, %v5873_v2  ;;  %v4811_v44 = vcombine.low %v589_v60, %v599_v61  ;;  %v607_v49 = vor.u32 %v606_v54, %v603_v50  ;;  %v622_v16 = vrot.slane %v620_v31, 5 }
  0x48   : > { %v4806_v41 = vcombine.low %v1305_v7, %v1308_v29  ;;  %v3471_v2 = vrot.slane %v4531_v33, 9  ;;  %v617_v26 = vor.u32 %v616_v63, %v612_v3  ;;  %v1313_v37 = vrot.slane %v5876_v12, 4 }
  0x49   : > { %5875 = vst [vmem:[#allocation12_spill] sm:$0xff] %v4811_v44  ;;  %v625_v30 = vshrl.u32 %v4800_v21, 16  ;;  %v628_v17 = vshll.u32 %v4800_v21, 16  ;;  %3946 = vmatmul.mubr.msk.bf16.gmra.mrb[16].mxu0 %vm770_vm3, %v4811_v44  ;;  %3813 = vmatprep.mubr.msk.bf16.mxu1 %vm770_vm3, %v4811_v44  ;;  %v608_v7 = vrot.slane %v607_v49, 4  ;;  %v5877_v18 = vmov %v5876_v12  ;;  %v4842_v44 = vld [vmem:[%s4488_s10 + $0x9c] sm:$0xf] }
  0x4a   : > { %5874 = vst [vmem:[#allocation11_spill] sm:$0xff] %v4806_v41  ;;  %v1312_v50 = vsel %vm4764_vm7, %v3471_v2, %v5877_v18  ;;  %v634_v12 = vshll.u32 %v4809_v19, 16  ;;  %v638_v51 = vshrl.u32 %v4809_v19, 16  ;;  %3963 = vmatprep.mubr.msk.bf16.mxu0 %vm770_vm3, %v4806_v41  ;;  %v618_v60 = vrot.slane %v617_v26, 4 }
  0x4b   : > { %v5878_v29 = vrot.slane %v4548_v46, 5  ;;  %v627_v31 = vrot.slane %v625_v30, 4  ;;  %v630_v61 = vrot.slane %v628_v17, 5  ;;  %v613_v63 = vsel %vm4535_vm4, %v608_v7, %v612_v3  ;;  %v4849_v30 = vld [vmem:[%s4488_s10 + $0xa0] sm:$0xf] }
  0x4c   : > { %v636_v2 = vrot.slane %v634_v12, 5  ;;  %v640_v18 = vrot.slane %v638_v51, 4  ;;  %v623_v26 = vsel %vm4535_vm4, %v618_v60, %v622_v16  ;;  %v644_v46 = vshll.u32 %v4827_v45, 16 }
  0x4d   : > { %v1315_v54 = vsel %vm4764_vm7, %v1313_v37, %v5878_v29  ;;  %v631_v43 = vor.u32 %v630_v61, %v627_v31  ;;  %v3472_v37 = vrot.slane %v4558_v57, 9  ;;  %v4851_v17 = vcombine.low %v613_v63, %v623_v26  ;;  %v4856_v29 = vld [vmem:[%s4488_s10 + $0xa4] sm:$0x1] }
  0x4e   : > { %v4839_v49 = vcombine.low %v1312_v50, %v1315_v54  ;;  %v641_v3 = vor.u32 %v640_v18, %v636_v2  ;;  %v1318_v7 = vrot.slane %v4563_v62, 5  ;;  %v1321_v50 = vrot.slane %v4571_v4, 5 }
  0x4f   : > { %5880 = vst [vmem:[#allocation14_spill] sm:$0xff] %v4851_v17  ;;  %v632_v12 = vrot.slane %v631_v43, 4  ;;  %v646_v51 = vrot.slane %v644_v46, 5  ;;  %v649_v16 = vshrl.u32 %v4842_v44, 16  ;;  %v652_v60 = vshll.u32 %v4842_v44, 16  ;;  %3814 = vmatmul.mubr.msk.bf16.gmra.mrb[20].mxu1 %vm770_vm3, %v4851_v17 }
  0x50   : > { %5879 = vst [vmem:[#allocation13_spill] sm:$0xff] %v4839_v49  ;;  %v642_v54 = vrot.slane %v641_v3, 4  ;;  %v1319_v31 = vsel %vm4764_vm7, %v3472_v37, %v1318_v7  ;;  %v1320_v61 = vrot.slane %v1318_v7, 4  ;;  %v658_v63 = vshll.u32 %v4849_v30, 16  ;;  %v4871_v46 = vld [vmem:[%s5827_s1 + $0x1c] sm:$0xf] }
  0x51   : > { %v637_v4 = vsel %vm4535_vm4, %v632_v12, %v636_v2  ;;  %v651_v43 = vrot.slane %v649_v16, 4  ;;  %v654_v18 = vrot.slane %v652_v60, 5  ;;  %v662_v26 = vshrl.u32 %v4849_v30, 16  ;;  %5881 = vst [vmem:[#allocation15_spill] sm:$0xff] %v4871_v46  ;;  %3964 = vmatmul.mubr.msk.bf16.vlgmr.msra.gmra.mrb[0].mxu0 %vm770_vm3, %v4839_v49  ;;  %v4881_v12 = vld [vmem:[%s4488_s10 + $0xa8] sm:$0xf] }
  0x52   : > { %v647_v37 = vsel %vm4535_vm4, %v642_v54, %v646_v51  ;;  %v1322_v3 = vsel %vm4764_vm7, %v1320_v61, %v1321_v50  ;;  %v660_v7 = vrot.slane %v658_v63, 5  ;;  %v668_v2 = vshll.u32 %v4856_v29, 16  ;;  %5882 = vst [vmem:[#allocation16_spill] sm:$0xff] %v4881_v12  ;;  %3996 = vmatpush3.bf16.msra.mxu0 %v4523_v20  ;;  %v4901_v20 = vld [vmem:[%s4488_s10 + $0xb0] sm:$0x1] }
  0x53   : > { %v4883_v16 = vcombine.low %v637_v4, %v647_v37  ;;  %v4885_v60 = vcombine.low %v1319_v31, %v1322_v3  ;;  %v655_v17 = vor.u32 %v654_v18, %v651_v43  ;;  %v664_v25 = vrot.slane %v662_v26, 4  ;;  %4371 = vmatprep.subr.msk.bf16.mxu0 %vm819_vm0, %v4871_v46  ;;  %5885 = vst [vmem:[#allocation19_spill] sm:$0xff] %v4901_v20 }
  0x54   : > { %v670_v51 = vrot.slane %v668_v2, 5  ;;  %v3473_v54 = vrot.slane %v4577_v14, 9  ;;  %v1325_v50 = vrot.slane %v4589_v28, 5  ;;  %v1328_v61 = vrot.slane %v4596_v32, 5 }
  0x55   : > { %5883 = vst [vmem:[#allocation17_spill] sm:$0xff] %v4883_v16  ;;  %5884 = vst [vmem:[#allocation18_spill] sm:$0xff] %v4885_v60  ;;  %3817 = vmatprep.mubr.msk.bf16.mxu1 %vm770_vm3, %v4883_v16  ;;  %3967 = vmatprep.mubr.msk.bf16.mxu0 %vm770_vm3, %v4885_v60  ;;  %v656_v31 = vrot.slane %v655_v17, 4  ;;  %v665_v63 = vor.u32 %v664_v25, %v660_v7  ;;  %v673_v4 = vshrl.u32 %v4881_v12, 16  ;;  %v676_v43 = vshll.u32 %v4881_v12, 16 }
  0x56   : > { %v1326_v32 = vsel %vm4764_vm7, %v3473_v54, %v1325_v50  ;;  %v1327_v18 = vrot.slane %v1325_v50, 4  ;;  %v682_v26 = vshll.u32 %v4888_v53, 16  ;;  %v686_v37 = vshrl.u32 %v4888_v53, 16  ;;  %v4915_v50 = vld [vmem:[%s4488_s10 + $0xb4] sm:$0xf] }
  0x57   : > { %v661_v17 = vsel %vm4535_vm4, %v656_v31, %v660_v7  ;;  %v666_v25 = vrot.slane %v665_v63, 4  ;;  %v675_v3 = vrot.slane %v673_v4, 4  ;;  %v678_v2 = vrot.slane %v676_v43, 5  ;;  %v4923_v31 = vld [vmem:[%s4488_s10 + $0xb8] sm:$0xf] }
  0x58   : > { %v1329_v16 = vsel %vm4764_vm7, %v1327_v18, %v1328_v61  ;;  %v684_v60 = vrot.slane %v682_v26, 5  ;;  %v688_v49 = vrot.slane %v686_v37, 4  ;;  %v692_v54 = vshll.u32 %v4901_v20, 16 }
  0x59   : > { %v671_v41 = vsel %vm4535_vm4, %v666_v25, %v670_v51  ;;  %v4919_v46 = vcombine.low %v1326_v32, %v1329_v16  ;;  %v679_v12 = vor.u32 %v678_v2, %v675_v3  ;;  %v3474_v7 = vrot.slane %v4604_v48, 9  ;;  %v4932_v51 = vld [vmem:[%s4488_s10 + $0xbc] sm:$0x1] }
  0x5a   : > { %v4925_v63 = vcombine.low %v661_v17, %v671_v41  ;;  %v689_v61 = vor.u32 %v688_v49, %v684_v60  ;;  %v694_v4 = vrot.slane %v692_v54, 5  ;;  %v1332_v43 = vrot.slane %v4612_v52, 5 }
  0x5b   : > { %5886 = vst [vmem:[#allocation20_spill] sm:$0xff] %v4919_v46  ;;  %3968 = vmatmul.mubr.msk.bf16.gmra.mrb[4].mxu0 %vm770_vm3, %v4919_v46  ;;  %v680_v18 = vrot.slane %v679_v12, 4  ;;  %v1335_v26 = vrot.slane %v4624_v5, 5  ;;  %v697_v16 = vshrl.u32 %v4915_v50, 16  ;;  %v700_v32 = vshll.u32 %v4915_v50, 16 }
  0x5c   : > { %5887 = vst [vmem:[#allocation21_spill] sm:$0xff] %v4925_v63  ;;  %3818 = vmatmul.mubr.msk.bf16.gmra.mrb[24].mxu1 %vm770_vm3, %v4925_v63  ;;  %v690_v41 = vrot.slane %v689_v61, 4  ;;  %v1333_v49 = vsel %vm4764_vm7, %v3474_v7, %v1332_v43  ;;  %v1334_v37 = vrot.slane %v1332_v43, 4  ;;  %v706_v17 = vshll.u32 %v4923_v31, 16 }
  0x5d   : > { %v685_v12 = vsel %vm4535_vm4, %v680_v18, %v684_v60  ;;  %v699_v5 = vrot.slane %v697_v16, 4  ;;  %v702_v25 = vrot.slane %v700_v32, 5  ;;  %v710_v3 = vshrl.u32 %v4923_v31, 16 }
  0x5e   : > { %v695_v2 = vsel %vm4535_vm4, %v690_v41, %v694_v4  ;;  %v1336_v54 = vsel %vm4764_vm7, %v1334_v37, %v1335_v26  ;;  %v708_v61 = vrot.slane %v706_v17, 5  ;;  %v716_v63 = vshll.u32 %v4932_v51, 16 }
  0x5f   : > { %v4949_v7 = vcombine.low %v685_v12, %v695_v2  ;;  %v4951_v43 = vcombine.low %v1333_v49, %v1336_v54  ;;  %v703_v46 = vor.u32 %v702_v25, %v699_v5  ;;  %v712_v20 = vrot.slane %v710_v3, 4 }
  0x60   : > { %v718_v60 = vrot.slane %v716_v63, 5  ;;  %v3475_v18 = vrot.slane %v4629_v13, 9  ;;  %v1339_v16 = vrot.slane %v4635_v24, 5  ;;  %v1342_v32 = vrot.slane %v4653_v8, 5 }
  0x61   : > { %3821 = vmatprep.mubr.msk.bf16.mxu1 %vm770_vm3, %v4949_v7  ;;  %3971 = vmatprep.mubr.msk.bf16.mxu0 %vm770_vm3, %v4951_v43  ;;  %v704_v4 = vrot.slane %v703_v46, 4  ;;  %v713_v26 = vor.u32 %v712_v20, %v708_v61  ;;  %v3476_v41 = vrot.slane %v4658_v42, 9  ;;  %v1346_v49 = vrot.slane %v4663_v6, 5 }
  0x62   : > { %v1340_v63 = vsel %vm4764_vm7, %v3475_v18, %v1339_v16  ;;  %v1341_v37 = vrot.slane %v1339_v16, 4  ;;  %v3437_v17 = vcombine.low %v4502_v9, %v4505_v10  ;;  %v1349_v8 = vrot.slane %v4676_v11, 5 }
  0x63   : > { %v709_v12 = vsel %vm4535_vm4, %v704_v4, %v708_v61  ;;  %v714_v5 = vrot.slane %v713_v26, 4  ;;  %v1347_v46 = vsel %vm4764_vm7, %v3476_v41, %v1346_v49  ;;  %v1348_v20 = vrot.slane %v1346_v49, 4 }
  0x64   : > { %v1343_v25 = vsel %vm4764_vm7, %v1341_v37, %v1342_v32  ;;  %v3477_v3 = vrot.slane %v4680_v15, 9  ;;  %v1353_v2 = vrot.slane %v4685_v27, 5  ;;  %v1356_v54 = vrot.slane %v4699_v47, 5 }
  0x65   : > { %v719_v9 = vsel %vm4535_vm4, %v714_v5, %v718_v60  ;;  %v4978_v10 = vcombine.low %v1340_v63, %v1343_v25  ;;  %v1350_v11 = vsel %vm4764_vm7, %v1348_v20, %v1349_v8  ;;  %v3478_v61 = vrot.slane %v4704_v59, 9 }
  0x66   : > { %v4983_v18 = vcombine.low %v709_v12, %v719_v9  ;;  %v4985_v16 = vcombine.low %v1347_v46, %v1350_v11  ;;  %v1355_v32 = vrot.slane %v1353_v2, 4  ;;  %v1360_v47 = vrot.slane %v4710_v0, 5 }
  0x67   : > { %3972 = vmatmul.mubr.msk.bf16.gmra.mrb[8].mxu0 %vm770_vm3, %v4978_v10  ;;  %v1363_v4 = vrot.slane %v4718_v36, 5  ;;  %v1354_v60 = vsel %vm4764_vm7, %v3477_v3, %v1353_v2  ;;  %v1367_v41 = vrot.slane %v4735_v22, 5  ;;  %v1374_v63 = vrot.slane %v4777_v56, 5 }
  0x68   : > { %3822 = vmatmul.mubr.msk.bf16.gmra.mrb[28].mxu1 %vm770_vm3, %v4983_v18  ;;  %3975 = vmatprep.mubr.msk.bf16.mxu0 %vm770_vm3, %v4985_v16  ;;  %v1357_v26 = vsel %vm4764_vm7, %v1355_v32, %v1356_v54  ;;  %v1361_v49 = vsel %vm4764_vm7, %v3478_v61, %v1360_v47  ;;  %v1362_v36 = vrot.slane %v1360_v47, 4  ;;  %v3479_v5 = vrot.slane %v4729_v55, 9 }
  0x69   : > { %3827 = vmatprep.mubr.msk.bf16.mxu1 %vm770_vm3, %v3437_v17  ;;  %v5004_v37 = vcombine.low %v1354_v60, %v1357_v26  ;;  %v1369_v46 = vrot.slane %v1367_v41, 4  ;;  %v1370_v20 = vrot.slane %v4742_v1, 5  ;;  %v5014_v17 = vcombine.low %v4531_v33, %v4544_v39  ;;  %v5030_v33 = vld [vmem:[%s5827_s1 + $0xc] sm:$0xf] }
  0x6a   : > { %v1364_v8 = vsel %vm4764_vm7, %v1362_v36, %v1363_v4  ;;  %v3480_v25 = vrot.slane %v4757_v58, 9  ;;  %v1376_v3 = vrot.slane %v1374_v63, 4  ;;  %v1377_v2 = vrot.slane %v4782_v40, 5  ;;  %v5889_v36 = vld [vmem:[#allocation19_spill] sm:$0xff] }
  0x6b   : > { %v5008_v12 = vcombine.low %v1361_v49, %v1364_v8  ;;  %v1506_v54 = vsel %vm819_vm0, %v4584_v23, 0  ;;  %v1381_v9 = vrot.slane %v4809_v19, 5  ;;  %v5025_v1 = vcombine.low %v4658_v42, %v4663_v6 }
  0x6c   : > { %v1368_v39 = vsel %vm4764_vm7, %v3479_v5, %v1367_v41  ;;  %v1371_v23 = vsel %vm4764_vm7, %v1369_v46, %v1370_v20  ;;  %v1375_v42 = vsel %vm4764_vm7, %v3480_v25, %v1374_v63  ;;  %v1378_v6 = vsel %vm4764_vm7, %v1376_v3, %v1377_v2  ;;  %v5128_v25 = vld [vmem:[%s4488_s10 + $0xc4] sm:$0xf]  ;;  %v328_v2 = vld [vmem:[%s4488_s10 + $0xc8] sm:$0x1] }
  0x6d   : > { %v1388_v40 = vrot.slane %v4849_v30, 5  ;;  %v5049_v11 = vcombine.low %v4680_v15, %v4685_v27  ;;  %v5053_v61 = vcombine.low %v4558_v57, %v4563_v62  ;;  %v5057_v32 = vcombine.low %v4704_v59, %v4710_v0 }
  0x6e   : > { %v5061_v47 = vcombine.low %v1368_v39, %v1371_v23  ;;  %v5065_v4 = vcombine.low %v4577_v14, %v4589_v28  ;;  %v3481_v15 = vrot.slane %v4800_v21, 9  ;;  %v1383_v27 = vrot.slane %v1381_v9, 4 }
  0x6f   : > { %3976 = vmatmul.mubr.msk.bf16.gmra.mrb[12].mxu0 %vm770_vm3, %v5004_v37  ;;  %v5068_v60 = vcombine.low %v1375_v42, %v1378_v6  ;;  %v1384_v57 = vrot.slane %v4827_v45, 5  ;;  %v3482_v62 = vrot.slane %v4842_v44, 9  ;;  %v1391_v59 = vrot.slane %v4856_v29, 5  ;;  %v5888_v29 = vld [vmem:[#allocation16_spill] sm:$0xff] }
  0x70   : > { %3828 = vmatmul.mubr.msk.bf16.vlgmr.msra.gmra.mrb[0].mxu1 %vm770_vm3, %v4541_v38  ;;  %3979 = vmatprep.mubr.msk.bf16.mxu0 %vm770_vm3, %v5008_v12  ;;  %v1390_v0 = vrot.slane %v1388_v40, 4  ;;  %v5075_v26 = vcombine.low %v4729_v55, %v4735_v22  ;;  %v5079_v14 = vcombine.low %v4757_v58, %v4777_v56  ;;  %v5083_v28 = vcombine.low %v4800_v21, %v4809_v19 }
  0x71   : > { %3860 = vmatpush3.bf16.msra.mxu1 %v1506_v54  ;;  %3831 = vmatprep.mubr.msk.bf16.mxu1 %vm770_vm3, %v5014_v17  ;;  %v5089_v45 = vcombine.low %v4842_v44, %v4849_v30  ;;  %v5093_v41 = vcombine.low %v5888_v29, %v4888_v53  ;;  %v5097_v55 = vcombine.low %v4915_v50, %v4923_v31  ;;  %v1395_v58 = vrot.slane %v4888_v53, 5 }
  0x72   : > { %4366 = vmatprep.subr.msk.bf16.mxu1 %vm819_vm0, %v5030_v33  ;;  %v1382_v22 = vsel %vm4764_vm7, %v3481_v15, %v1381_v9  ;;  %v1385_v44 = vsel %vm4764_vm7, %v1383_v27, %v1384_v57  ;;  %v1402_v56 = vrot.slane %v4923_v31, 5  ;;  %v1389_v21 = vsel %vm4764_vm7, %v3482_v62, %v1388_v40 }
  0x73   : > { %v1392_v19 = vsel %vm4764_vm7, %v1390_v0, %v1391_v59  ;;  %v5117_v30 = vcombine.low %v4604_v48, %v4612_v52  ;;  %v5119_v49 = vcombine.low %v1382_v22, %v1385_v44  ;;  %v3483_v53 = vrot.slane %v5888_v29, 9 }
  0x74   : > { %v1398_v31 = vrot.slane %v5889_v36, 5  ;;  %v3484_v63 = vrot.slane %v4915_v50, 9  ;;  %v5124_v8 = vcombine.low %v1389_v21, %v1392_v19  ;;  %v1397_v5 = vrot.slane %v1395_v58, 4  ;;  %v5139_v50 = vld [vmem:[%s4488_s10 + $0xc0] sm:$0xf] }
  0x75   : > { %v1404_v46 = vrot.slane %v1402_v56, 4  ;;  %v1405_v20 = vrot.slane %v4932_v51, 5  ;;  %v5132_v48 = vcombine.low %v4629_v13, %v4635_v24  ;;  %v1396_v52 = vsel %vm4764_vm7, %v3483_v53, %v1395_v58 }
  0x76   : > { %v2138_v3 = vrot.slane %v5128_v25, 5  ;;  %v1399_v13 = vsel %vm4764_vm7, %v1397_v5, %v1398_v31  ;;  %v1403_v24 = vsel %vm4764_vm7, %v3484_v63, %v1402_v56  ;;  %v3554_v54 = vrot.slane %v5139_v50, 9 }
  0x77   : > { %3980 = vmatmul.mubr.msk.bf16.gmra.mrb[16].mxu0 %vm770_vm3, %v5061_v47  ;;  %v1406_v51 = vsel %vm4764_vm7, %v1404_v46, %v1405_v20  ;;  %v5156_v9 = vcombine.low %v1396_v52, %v1399_v13  ;;  %v2141_v42 = vrot.slane %v328_v2, 5  ;;  %v1908_v6 = vshrl.u32 %v5139_v50, 16  ;;  %v5890_v46 = vld [vmem:[#allocation15_spill] sm:$0xff]  ;;  %v3610_v52 = vld [vmem:[%s5827_s1 + $0x20] sm:$0xf] }
  0x78   : > { %3832 = vmatmul.mubr.msk.bf16.gmra.mrb[4].mxu1 %vm770_vm3, %v5053_v61  ;;  %3983 = vmatprep.mubr.msk.bf16.mxu0 %vm770_vm3, %v5068_v60  ;;  %v5158_v39 = vcombine.low %v1403_v24, %v1406_v51  ;;  %v2140_v23 = vrot.slane %v2138_v3, 4  ;;  %v1911_v40 = vshll.u32 %v5139_v50, 16  ;;  %v1917_v15 = vshll.u32 %v5128_v25, 16  ;;  %v4405_v24 = vld [vmem:[%s4488_s10 + $0x8] sm:$0x1] }
  0x79   : > { %3835 = vmatprep.mubr.msk.bf16.mxu1 %vm770_vm3, %v5065_v4  ;;  %v1921_v27 = vshrl.u32 %v5128_v25, 16  ;;  %v1910_v57 = vrot.slane %v1908_v6, 4  ;;  %v2139_v29 = vsel %vm4764_vm7, %v3554_v54, %v2138_v3  ;;  %v1927_v56 = vshll.u32 %v328_v2, 16  ;;  %v4404_v3 = vld [vmem:[%s4488_s10 + $0x4] sm:$0xf] }
  0x7a   : > { %v1913_v62 = vrot.slane %v1911_v40, 5  ;;  %v1919_v59 = vrot.slane %v1917_v15, 5  ;;  %v2142_v22 = vsel %vm4764_vm7, %v2140_v23, %v2141_v42  ;;  %v2586_v20 = vsel %vm819_vm0, %v5890_v46, 0  ;;  %v4406_v2 = vld [vmem:[%s4488_s10] sm:$0xf]  ;;  %v5903_v46 = vld [vmem:[#allocation12_spill] sm:$0xff] }
  0x7b   : > { %v1923_v0 = vrot.slane %v1921_v27, 4  ;;  %v1929_v53 = vrot.slane %v1927_v56, 5  ;;  %v5176_v36 = vcombine.low %v2139_v29, %v2142_v22  ;;  %v1297_v13 = vrot.slane %v4404_v3, 5  ;;  %v5891_v27 = vld [vmem:[#allocation11_spill] sm:$0xff]  ;;  %v5272_v22 = vld [vmem:[%s4488_s10 + $0xd0] sm:$0xf] }
  0x7c   : > { %v1914_v44 = vor.u32 %v1913_v62, %v1910_v57  ;;  %v1300_v51 = vrot.slane %v4405_v24, 5  ;;  %v3469_v54 = vrot.slane %v4406_v2, 9  ;;  %v1712_v15 = vsel %vm819_vm0, %v5030_v33, 0  ;;  %v5892_v57 = vld [vmem:[#allocation13_spill] sm:$0xff]  ;;  %v4407_v62 = vld [vmem:[%s5827_s1 + $0x10] sm:$0xf] }
  0x7d   : > { %v1924_v58 = vor.u32 %v1923_v0, %v1919_v59  ;;  %v1299_v23 = vrot.slane %v1297_v13, 4  ;;  %v5893_v33 = vld [vmem:[#allocation18_spill] sm:$0xff]  ;;  %v5260_v0 = vcombine.low %v5139_v50, %v5128_v25  ;;  %v5269_v29 = vld [vmem:[%s4488_s10 + $0xcc] sm:$0xf]  ;;  %v5897_v56 = vld [vmem:[#allocation5_spill] sm:$0xff] }
  0x7e   : > { %v1915_v21 = vrot.slane %v1914_v44, 4  ;;  %v1298_v42 = vsel %vm4764_vm7, %v3469_v54, %v1297_v13  ;;  %v3574_v25 = vcombine.low %v5269_v29, %v5272_v22  ;;  %v5895_v50 = vld [vmem:[#allocation3_spill] sm:$0xff]  ;;  %v2798_v44 = vsel %vm819_vm0, %v3610_v52, 0  ;;  %v5905_v3 = vld [vmem:[#allocation14_spill] sm:$0xff]  ;;  %v5906_v24 = vld [vmem:[#allocation17_spill] sm:$0xff] }
  0x7f   : > { %3984 = vmatmul.mubr.msk.bf16.gmra.mrb[20].mxu0 %vm770_vm3, %v5119_v49  ;;  %v1925_v19 = vrot.slane %v1924_v58, 4  ;;  %v1301_v6 = vsel %vm4764_vm7, %v1299_v23, %v1300_v51  ;;  %v5896_v58 = vld [vmem:[#allocation4_spill] sm:$0xff]  ;;  %v2557_v13 = vshll.u32 %v5269_v29, 16 }
  0x80   : > { %3836 = vmatmul.mubr.msk.bf16.gmra.mrb[8].mxu1 %vm770_vm3, %v5117_v30  ;;  %3987 = vmatprep.mubr.msk.bf16.mxu0 %vm770_vm3, %v5124_v8  ;;  %v1920_v31 = vsel %vm4535_vm4, %v1915_v21, %v1919_v59  ;;  %v3486_v40 = vcombine.low %v1298_v42, %v1301_v6  ;;  %v5894_v59 = vld [vmem:[#allocation20_spill] sm:$0xff]  ;;  %v5898_v21 = vld [vmem:[#allocation6_spill] sm:$0xff]  ;;  %v5907_v6 = vld [vmem:[#allocation21_spill] sm:$0xff] }
  0x81   : > { %3839 = vmatprep.mubr.msk.bf16.mxu1 %vm770_vm3, %v5132_v48  ;;  %v1930_v63 = vsel %vm4535_vm4, %v1925_v19, %v1929_v53  ;;  %v5899_v19 = vld [vmem:[#allocation7_spill] sm:$0xff]  ;;  %v5900_v53 = vld [vmem:[#allocation8_spill] sm:$0xff]  ;;  %v2559_v2 = vrot.slane %v2557_v13, 5 }
  0x82   : > { %v5182_v5 = vcombine.low %v1920_v31, %v1930_v63  ;;  %v5901_v31 = vld [vmem:[#allocation9_spill] sm:$0xff]  ;;  %v5902_v63 = vld [vmem:[#allocation10_spill] sm:$0xff]  ;;  %v5333_v42 = vld [vmem:[%s4488_s10 + $0xd4] sm:$0x1] }
  0x87   : > { %3988 = vmatmul.mubr.msk.bf16.gmra.mrb[24].mxu0 %vm770_vm3, %v5156_v9 }
  0x88   : > { %3840 = vmatmul.mubr.msk.bf16.gmra.mrb[12].mxu1 %vm770_vm3, %v5025_v1  ;;  %3991 = vmatprep.mubr.msk.bf16.mxu0 %vm770_vm3, %v5158_v39 }
  0x89   : > { %3843 = vmatprep.mubr.msk.bf16.mxu1 %vm770_vm3, %v5049_v11 }
  0x8f   : > { %3992 = vmatmul.mubr.msk.bf16.gmra.mrb[28].mxu0 %vm770_vm3, %v5176_v36 }
  0x90   : > { %3844 = vmatmul.mubr.msk.bf16.gmra.mrb[16].mxu1 %vm770_vm3, %v5057_v32  ;;  %3997 = vmatprep.mubr.msk.bf16.mxu0 %vm770_vm3, %v5014_v17 }
  0x91   : > { %3847 = vmatprep.mubr.msk.bf16.mxu1 %vm770_vm3, %v5075_v26 }
  0x97   : > { %3998 = vmatmul.mubr.msk.bf16.vlgmr.msra.gmra.mrb[0].mxu0 %vm770_vm3, %v5053_v61 }
  0x98   : > { %3848 = vmatmul.mubr.msk.bf16.gmra.mrb[20].mxu1 %vm770_vm3, %v5079_v14  ;;  %4001 = vmatprep.mubr.msk.bf16.mxu0 %vm770_vm3, %v5065_v4 }
  0x99   : > { %3851 = vmatprep.mubr.msk.bf16.mxu1 %vm770_vm3, %v5083_v28  ;;  %4030 = vmatpush3.bf16.msra.mxu0 %v2586_v20  ;;  %v5904_v20 = vld [vmem:[#allocation2_spill] sm:$0xff] }
  0x9a   : > { %4372 = vmatprep.subr.msk.bf16.mxu0 %vm819_vm0, %v3610_v52  ;;  %v4416_v52 = vmov 0.0  }
  0x9f   : > { %4002 = vmatmul.mubr.msk.bf16.gmra.mrb[4].mxu0 %vm770_vm3, %v5117_v30 }
  0xa0   : > { %3852 = vmatmul.mubr.msk.bf16.gmra.mrb[24].mxu1 %vm770_vm3, %v5089_v45  ;;  %4005 = vmatprep.mubr.msk.bf16.mxu0 %vm770_vm3, %v5132_v48 }
  0xa1   : > { %3855 = vmatprep.mubr.msk.bf16.mxu1 %vm770_vm3, %v5093_v41 }
  0xa7   : > { %4006 = vmatmul.mubr.msk.bf16.gmra.mrb[8].mxu0 %vm770_vm3, %v5025_v1 }
  0xa8   : > { %3856 = vmatmul.mubr.msk.bf16.gmra.mrb[28].mxu1 %vm770_vm3, %v5097_v55  ;;  %4009 = vmatprep.mubr.msk.bf16.mxu0 %vm770_vm3, %v5049_v11 }
  0xa9   : > { %3861 = vmatprep.mubr.msk.bf16.mxu1 %vm770_vm3, %v3486_v40 }
  0xaf   : > { %4010 = vmatmul.mubr.msk.bf16.gmra.mrb[12].mxu0 %vm770_vm3, %v5057_v32 }
  0xb0   : > { %3862 = vmatmul.mubr.msk.bf16.vlgmr.msra.gmra.mrb[0].mxu1 %vm770_vm3, %v5891_v27  ;;  %4013 = vmatprep.mubr.msk.bf16.mxu0 %vm770_vm3, %v5075_v26 }
  0xb1   : > { %3894 = vmatpush3.bf16.msra.mxu1 %v1712_v15  ;;  %3865 = vmatprep.mubr.msk.bf16.mxu1 %vm770_vm3, %v5892_v57  ;;  %v2573_v15 = vshll.u32 %v5333_v42, 16 }
  0xb2   : > { %4368 = vmatprep.subr.msk.bf16.mxu1 %vm819_vm0, %v4407_v62 }
  0xb3   : > { %v2575_v62 = vrot.slane %v2573_v15, 5 }
  0xb7   : > { %4014 = vmatmul.mubr.msk.bf16.gmra.mrb[16].mxu0 %vm770_vm3, %v5079_v14 }
  0xb8   : > { %3866 = vmatmul.mubr.msk.bf16.gmra.mrb[4].mxu1 %vm770_vm3, %v5893_v33  ;;  %4017 = vmatprep.mubr.msk.bf16.mxu0 %vm770_vm3, %v5083_v28 }
  0xb9   : > { %3869 = vmatprep.mubr.msk.bf16.mxu1 %vm770_vm3, %v5894_v59 }
  0xbf   : > { %4018 = vmatmul.mubr.msk.bf16.gmra.mrb[20].mxu0 %vm770_vm3, %v5089_v45 }
  0xc0   : > { %3870 = vmatmul.mubr.msk.bf16.gmra.mrb[8].mxu1 %vm770_vm3, %v4951_v43  ;;  %4021 = vmatprep.mubr.msk.bf16.mxu0 %vm770_vm3, %v5093_v41 }
  0xc1   : > { %3873 = vmatprep.mubr.msk.bf16.mxu1 %vm770_vm3, %v4978_v10 }
  0xc7   : > { %4022 = vmatmul.mubr.msk.bf16.gmra.mrb[24].mxu0 %vm770_vm3, %v5097_v55 }
  0xc8   : > { %3874 = vmatmul.mubr.msk.bf16.gmra.mrb[12].mxu1 %vm770_vm3, %v4985_v16  ;;  %4025 = vmatprep.mubr.msk.bf16.mxu0 %vm770_vm3, %v5260_v0 }
  0xc9   : > { %3877 = vmatprep.mubr.msk.bf16.mxu1 %vm770_vm3, %v5004_v37 }
  0xcf   : > { %4026 = vmatmul.mubr.msk.bf16.gmra.mrb[28].mxu0 %vm770_vm3, %v3574_v25 }
  0xd0   : > { %3878 = vmatmul.mubr.msk.bf16.gmra.mrb[16].mxu1 %vm770_vm3, %v5008_v12  ;;  %4031 = vmatprep.mubr.msk.bf16.mxu0 %vm770_vm3, %v5895_v50 }
  0xd1   : > { %3881 = vmatprep.mubr.msk.bf16.mxu1 %vm770_vm3, %v5061_v47 }
  0xd7   : > { %4032 = vmatmul.mubr.msk.bf16.vlgmr.msra.gmra.mrb[0].mxu0 %vm770_vm3, %v5896_v58 }
  0xd8   : > { %3882 = vmatmul.mubr.msk.bf16.gmra.mrb[20].mxu1 %vm770_vm3, %v5068_v60  ;;  %4035 = vmatprep.mubr.msk.bf16.mxu0 %vm770_vm3, %v5897_v56 }
  0xd9   : > { %3885 = vmatprep.mubr.msk.bf16.mxu1 %vm770_vm3, %v5119_v49  ;;  %4064 = vmatpush3.bf16.msra.mxu0 %v2798_v44 }
  0xdf   : > { %4036 = vmatmul.mubr.msk.bf16.gmra.mrb[4].mxu0 %vm770_vm3, %v5898_v21 }
  0xe0   : > { %3886 = vmatmul.mubr.msk.bf16.gmra.mrb[24].mxu1 %vm770_vm3, %v5124_v8  ;;  %4039 = vmatprep.mubr.msk.bf16.mxu0 %vm770_vm3, %v5899_v19 }
  0xe1   : > { %3889 = vmatprep.mubr.msk.bf16.mxu1 %vm770_vm3, %v5156_v9 }
  0xe7   : > { %4040 = vmatmul.mubr.msk.bf16.gmra.mrb[8].mxu0 %vm770_vm3, %v5900_v53 }
  0xe8   : > { %3890 = vmatmul.mubr.msk.bf16.gmra.mrb[28].mxu1 %vm770_vm3, %v5158_v39  ;;  %4043 = vmatprep.mubr.msk.bf16.mxu0 %vm770_vm3, %v5901_v31 }
  0xe9   : > { %3895 = vmatprep.mubr.msk.bf16.mxu1 %vm770_vm3, %v4541_v38  ;;  %v2554_v38 = vshrl.u32 %v5269_v29, 16 }
  0xeb   : > { %v2556_v51 = vrot.slane %v2554_v38, 4 }
  0xef   : > { %4044 = vmatmul.mubr.msk.bf16.gmra.mrb[12].mxu0 %vm770_vm3, %v5902_v63 }
  0xf0   : > { %3896 = vmatmul.mubr.msk.bf16.vlgmr.msra.gmra.mrb[0].mxu1 %vm770_vm3, %v5014_v17  ;;  %4047 = vmatprep.mubr.msk.bf16.mxu0 %vm770_vm3, %v5903_v46  ;;  %v2567_v17 = vshrl.u32 %v5272_v22, 16 }
  0xf1   : > { %4106 = vmatpush3.bf16.msra.mxu1 %v5904_v20  ;;  %3899 = vmatprep.mubr.msk.bf16.mxu1 %vm770_vm3, %v5053_v61  ;;  %v2563_v61 = vshll.u32 %v5272_v22, 16 }
  0xf2   : > { %4097 = vmatprep.subr.bf16.mxu1 %v4416_v52  ;;  %v2569_v23 = vrot.slane %v2567_v17, 4 }
  0xf3   : > { %v2565_v54 = vrot.slane %v2563_v61, 5 }
  0xf5   : > { %v2570_v40 = vor.u32 %v2569_v23, %v2565_v54 }
  0xf7   : > { %4048 = vmatmul.mubr.msk.bf16.gmra.mrb[16].mxu0 %vm770_vm3, %v5905_v3  ;;  %v2571_v27 = vrot.slane %v2570_v40, 4 }
  0xf8   : > { %3900 = vmatmul.mubr.msk.bf16.gmra.mrb[4].mxu1 %vm770_vm3, %v5065_v4  ;;  %4051 = vmatprep.mubr.msk.bf16.mxu0 %vm770_vm3, %v5906_v24  ;;  %v2560_v4 = vor.u32 %v2559_v2, %v2556_v51 }
  0xf9   : > { %3903 = vmatprep.mubr.msk.bf16.mxu1 %vm770_vm3, %v5117_v30  ;;  %v2576_v25 = vsel %vm4535_vm4, %v2571_v27, %v2575_v62 }
  0xfa   : > { %v2561_v30 = vrot.slane %v2560_v4, 4 }
  0xff   : > { %4052 = vmatmul.mubr.msk.bf16.gmra.mrb[20].mxu0 %vm770_vm3, %v5907_v6 }
 0x100   : > { %3904 = vmatmul.mubr.msk.bf16.gmra.mrb[8].mxu1 %vm770_vm3, %v5132_v48  ;;  %4055 = vmatprep.mubr.msk.bf16.mxu0 %vm770_vm3, %v4949_v7  ;;  %v2566_v48 = vsel %vm4535_vm4, %v2561_v30, %v2565_v54 }
 0x101   : > { %3907 = vmatprep.mubr.msk.bf16.mxu1 %vm770_vm3, %v5025_v1  ;;  %v3592_v1 = vcombine.low %v2566_v48, %v2576_v25 }
 0x107   : > { %4056 = vmatmul.mubr.msk.bf16.gmra.mrb[24].mxu0 %vm770_vm3, %v4983_v18 }
 0x108   : > { %3908 = vmatmul.mubr.msk.bf16.gmra.mrb[12].mxu1 %vm770_vm3, %v5049_v11  ;;  %4059 = vmatprep.mubr.msk.bf16.mxu0 %vm770_vm3, %v5182_v5 }
 0x109   : > { %3911 = vmatprep.mubr.msk.bf16.mxu1 %vm770_vm3, %v5057_v32 }
 0x10f   : > { %4060 = vmatmul.mubr.msk.bf16.gmra.mrb[28].mxu0 %vm770_vm3, %v3592_v1 }
 0x110   : > { %3912 = vmatmul.mubr.msk.bf16.gmra.mrb[16].mxu1 %vm770_vm3, %v5075_v26  ;;  %4065 = vmatprep.mubr.msk.bf16.mxu0 %vm770_vm3, %v5892_v57 }
 0x111   : > { %3915 = vmatprep.mubr.msk.bf16.mxu1 %vm770_vm3, %v5079_v14 }
 0x117   : > { %4066 = vmatmul.mubr.msk.bf16.vlgmr.msra.gmra.mrb[0].mxu0 %vm770_vm3, %v5893_v33 }
 0x118   : > { %3916 = vmatmul.mubr.msk.bf16.gmra.mrb[20].mxu1 %vm770_vm3, %v5083_v28  ;;  %4069 = vmatprep.mubr.msk.bf16.mxu0 %vm770_vm3, %v5894_v59 }
 0x119   : > { %3919 = vmatprep.mubr.msk.bf16.mxu1 %vm770_vm3, %v5089_v45 }
 0x11f   : > { %4070 = vmatmul.mubr.msk.bf16.gmra.mrb[4].mxu0 %vm770_vm3, %v4951_v43  ;;  %v4403_v43 = vld [vmem:[%s5829_s3 + $0x8] sm:$0xff]  }
 0x120   : > { %3920 = vmatmul.mubr.msk.bf16.gmra.mrb[24].mxu1 %vm770_vm3, %v5093_v41  ;;  %4073 = vmatprep.mubr.msk.bf16.mxu0 %vm770_vm3, %v4978_v10  ;;  %v2784_v10 = vrot.slane %v5272_v22, 5 }
 0x121   : > { %3923 = vmatprep.mubr.msk.bf16.mxu1 %vm770_vm3, %v5097_v55 }
 0x127   : > { %4074 = vmatmul.mubr.msk.bf16.gmra.mrb[8].mxu0 %vm770_vm3, %v4985_v16  ;;  %v2787_v16 = vrot.slane %v5333_v42, 5 }
 0x128   : > { %3924 = vmatmul.mubr.msk.bf16.gmra.mrb[28].mxu1 %vm770_vm3, %v5260_v0  ;;  %4077 = vmatprep.mubr.msk.bf16.mxu0 %vm770_vm3, %v5004_v37  ;;  %v3062_v37 = vld [vmem:[%s267_s7] sm:$0x1] }
 0x129   : > { %3949 = vmatprep.mubr.msk.bf16.mxu1 %vm770_vm3, %v5905_v3 }
 0x12f   : > { %4078 = vmatmul.mubr.msk.bf16.gmra.mrb[12].mxu0 %vm770_vm3, %v5008_v12 }
 0x130   : > { %3950 = vmatmul.mubr.msk.bf16.vlgmr.msra.gmra.mrb[20].mxu1 %vm770_vm3, %v5906_v24  ;;  %4081 = vmatprep.mubr.msk.bf16.mxu0 %vm770_vm3, %v5061_v47 }
 0x131   : > { %4098 = vmatpush3.bf16.msra.mxu1 %v4402_v34  ;;  %3953 = vmatprep.mubr.msk.bf16.mxu1 %vm770_vm3, %v5907_v6 }
 0x132   : > { %4099 = vmatprep.subr.bf16.mxu1 %v4416_v52 }
 0x135   : > { %4100 = vmatpush3.bf16.msra.mxu1 %v4403_v43 }
 0x137   : > { %4082 = vmatmul.mubr.msk.bf16.gmra.mrb[16].mxu0 %vm770_vm3, %v5068_v60 }
 0x138   : > { %3954 = vmatmul.mubr.msk.bf16.gmra.mrb[24].mxu1 %vm770_vm3, %v4949_v7  ;;  %4085 = vmatprep.mubr.msk.bf16.mxu0 %vm770_vm3, %v5119_v49  ;;  %v3609_v7 = vrot.slane %v5269_v29, 9 }
 0x139   : > { %3957 = vmatprep.mubr.msk.bf16.mxu1 %vm770_vm3, %v4983_v18  ;;  %v2786_v18 = vrot.slane %v2784_v10, 4 }
 0x13a   : > { %v2785_v12 = vsel %vm4764_vm7, %v3609_v7, %v2784_v10  ;;  %v3124_v7 = vlaneseq }
 0x13b   : > { %v2788_v11 = vsel %vm4764_vm7, %v2786_v18, %v2787_v16  ;;  %v5436_v18 = vld [vmem:[%s5830_s4] ss:$0 sm:$0xff] }
 0x13c   : > { %v3611_v32 = vcombine.low %v2785_v12, %v2788_v11 }
 0x13f   : > { %4086 = vmatmul.mubr.msk.bf16.gmra.mrb[20].mxu0 %vm770_vm3, %v5124_v8 }
 0x140   : > { %3958 = vmatmul.mubr.msk.bf16.gmra.mrb[28].mxu1 %vm770_vm3, %v5182_v5  ;;  %4089 = vmatprep.mubr.msk.bf16.mxu0 %vm770_vm3, %v5156_v9 }
 0x141   : > { %4101 = vmatprep.mubr.msk.bf16.mxu1 %vm4417_vm8, %v4416_v52 }
 0x147   : > { %4090 = vmatmul.mubr.msk.bf16.gmra.mrb[24].mxu0 %vm770_vm3, %v5158_v39 }
 0x148   : > { %4102 = vmatmul.mubr.msk.bf16.vlgmr.msra.gmra.mrb[32].mxu1 %vm3080_vm9, %v3062_v37  ;;  %4093 = vmatprep.mubr.msk.bf16.mxu0 %vm770_vm3, %v5176_v36 }
 0x14f   : > { %4094 = vmatmul.mubr.msk.bf16.gmra.mrb[28].mxu0 %vm770_vm3, %v3611_v32 }
 0x1c3   : > { %v3897_v47 = vpop.f32.mrb[0].mxu1 }
 0x1c4   : > { %v1748_v60 = vpop.f32.mrb[1].mxu1 }
 0x1c5   : > { %v3898_v26 = vpop.f32.mrb[2].mxu1 }
 0x1c6   : > { %v1751_v14 = vpop.f32.mrb[3].mxu1 }
 0x1cb   : > { %v3901_v28 = vpop.f32.mrb[4].mxu1 }
 0x1cc   : > { %v1764_v45 = vpop.f32.mrb[5].mxu1 }
 0x1cd   : > { %v3902_v41 = vpop.f32.mrb[6].mxu1 }
 0x1ce   : > { %v1767_v55 = vpop.f32.mrb[7].mxu1 }
 0x1d3   : > { %v3905_v49 = vpop.f32.mrb[8].mxu1 }
 0x1d4   : > { %v1780_v8 = vpop.f32.mrb[9].mxu1 }
 0x1d5   : > { %v3906_v9 = vpop.f32.mrb[10].mxu1 }
 0x1d6   : > { %v1783_v39 = vpop.f32.mrb[11].mxu1 }
 0x1db   : > { %v3909_v36 = vpop.f32.mrb[12].mxu1 }
 0x1dc   : > { %v1796_v5 = vpop.f32.mrb[13].mxu1 }
 0x1dd   : > { %v3910_v57 = vpop.f32.mrb[14].mxu1 }
 0x1de   : > { %v1799_v35 = vpop.f32.mrb[15].mxu1 }
 0x1e3   : > { %v3913_v33 = vpop.f32.mrb[16].mxu1 }
 0x1e4   : > { %v1812_v59 = vpop.f32.mrb[17].mxu1 }
 0x1e5   : > { %v3914_v0 = vpop.f32.mrb[18].mxu1 }
 0x1e6   : > { %v1815_v29 = vpop.f32.mrb[19].mxu1 }
 0x1ea   : > { %v4067_v22 = vpop.f32.mrb[0].mxu0 }
 0x1eb   : > { %v4107_v50 = vadd.f32 %v4067_v22, %v3897_v47  ;;  %v2834_v44 = vpop.f32.mrb[1].mxu0 }
 0x1ec   : > { %v4108_v58 = vadd.f32 %v2834_v44, %v1748_v60  ;;  %v4068_v56 = vpop.f32.mrb[2].mxu0 }
 0x1ed   : > { %v4109_v21 = vadd.f32 %v4068_v56, %v3898_v26  ;;  %v2837_v19 = vpop.f32.mrb[3].mxu0 }
 0x1ee   : > { %v4110_v53 = vadd.f32 %v2837_v19, %v1751_v14 }
 0x1f2   : > { %v4071_v31 = vpop.f32.mrb[4].mxu0 }
 0x1f3   : > { %v4111_v63 = vadd.f32 %v4071_v31, %v3901_v28  ;;  %v2850_v46 = vpop.f32.mrb[5].mxu0  ;;  %v5445_v28 = vadd.f32 %v4107_v50, %v5436_v18 }
 0x1f4   : > { %v4112_v20 = vadd.f32 %v2850_v46, %v1764_v45  ;;  %v4072_v52 = vpop.f32.mrb[6].mxu0 }
 0x1f5   : > { %v4113_v3 = vadd.f32 %v4072_v52, %v3902_v41  ;;  %v2853_v38 = vpop.f32.mrb[7].mxu0 }
 0x1f6   : > { %v4114_v13 = vadd.f32 %v2853_v38, %v1767_v55  ;;  %v5449_v55 = vshrl.u32 %v3124_v7, 7 }
 0x1fa   : > { %v4075_v17 = vpop.f32.mrb[8].mxu0 }
 0x1fb   : > { %v4115_v24 = vadd.f32 %v4075_v17, %v3905_v49  ;;  %v2866_v61 = vpop.f32.mrb[9].mxu0  ;;  %v5452_v49 = vadd.f32 %v4108_v58, %v5436_v18 }
 0x1fc   : > { %v4116_v51 = vadd.f32 %v2866_v61, %v1780_v8  ;;  %v4076_v2 = vpop.f32.mrb[10].mxu0  ;;  %v5455_v8 = vadd.f32 %v4109_v21, %v5436_v18 }
 0x1fd   : > { %v4117_v54 = vadd.f32 %v4076_v2, %v3906_v9  ;;  %v2869_v23 = vpop.f32.mrb[11].mxu0  ;;  %v5458_v9 = vadd.f32 %v4110_v53, %v5436_v18  ;;  %v3030_v44 = vmax.f32 %v5452_v49, 0.0 }
 0x1fe   : > { %v4118_v42 = vadd.f32 %v2869_v23, %v1783_v39  ;;  %v3032_v39 = vmax.f32 %v5445_v28, 0.0  ;;  %v5481_v58 = vadd.f32 %v4116_v51, %v5436_v18  ;;  %v3033_v31 = vmax.f32 %v5455_v8, 0.0 }
 0x1ff   : > { %v5484_v56 = vadd.f32 %v4117_v54, %v5436_v18 }
 0x200   : > { %v5491_v46 = vadd.f32 %v4118_v42, %v5436_v18  ;;  %v3038_v42 = vmax.f32 %v5481_v58, 0.0 }
 0x202   : > { %v4079_v6 = vpop.f32.mrb[12].mxu0 }
 0x203   : > { %v3951_v4 = vpop.f32.mrb[20].mxu1  ;;  %v4119_v40 = vadd.f32 %v4079_v6, %v3909_v36  ;;  %v2882_v15 = vpop.f32.mrb[13].mxu0  ;;  %v5462_v36 = vadd.f32 %v4111_v63, %v5436_v18  ;;  %v3031_v63 = vmax.f32 %v5458_v9, 0.0  ;;  %v3041_v6 = vmax.f32 %v5484_v56, 0.0 }
 0x204   : > { %v2056_v30 = vpop.f32.mrb[21].mxu1  ;;  %v4120_v27 = vadd.f32 %v2882_v15, %v1796_v5  ;;  %v4080_v62 = vpop.f32.mrb[14].mxu0  ;;  %v5465_v5 = vadd.f32 %v4112_v20, %v5436_v18  ;;  %v3039_v15 = vmax.f32 %v5491_v46, 0.0 }
 0x205   : > { %v3952_v48 = vpop.f32.mrb[22].mxu1  ;;  %v4121_v25 = vadd.f32 %v4080_v62, %v3910_v57  ;;  %v2885_v1 = vpop.f32.mrb[15].mxu0  ;;  %v3036_v38 = vmax.f32 %v5462_v36, 0.0 }
 0x206   : > { %v2059_v34 = vpop.f32.mrb[23].mxu1  ;;  %v4122_v43 = vadd.f32 %v2885_v1, %v1799_v35  ;;  %v3126_v35 = vsub.s32 0, %v5449_v55  ;;  %v5500_v17 = vadd.f32 %v4120_v27, %v5436_v18  ;;  %v3034_v51 = vmax.f32 %v5465_v5, 0.0 }
 0x208   : > { %v3042_v1 = vmax.f32 %v5500_v17, 0.0 }
 0x20a   : > { %v4083_v10 = vpop.f32.mrb[16].mxu0 }
 0x20b   : > { %v5438_v16 = vpop.f32.mrb[24].mxu1  ;;  %v4123_v37 = vadd.f32 %v4083_v10, %v3913_v33  ;;  %v2898_v12 = vpop.f32.mrb[17].mxu0  ;;  %v5469_v33 = vadd.f32 %v4113_v3, %v5436_v18 }
 0x20c   : > { %v5440_v11 = vpop.f32.mrb[25].mxu1  ;;  %v4124_v32 = vadd.f32 %v2898_v12, %v1812_v59  ;;  %v4084_v47 = vpop.f32.mrb[18].mxu0  ;;  %v5472_v59 = vadd.f32 %v4114_v13, %v5436_v18  ;;  %v5497_v13 = vadd.f32 %v4119_v40, %v5436_v18  ;;  %v3011_v40 = vadd.f32 %v4122_v43, %v5436_v18 }
 0x20d   : > { %v5442_v60 = vpop.f32.mrb[26].mxu1  ;;  %v4125_v26 = vadd.f32 %v4084_v47, %v3914_v0  ;;  %v2901_v14 = vpop.f32.mrb[19].mxu0  ;;  %v5475_v0 = vadd.f32 %v4115_v24, %v5436_v18  ;;  %v3037_v2 = vmax.f32 %v5469_v33, 0.0 }
 0x20e   : > { %v5447_v45 = vpop.f32.mrb[27].mxu1  ;;  %v4126_v41 = vadd.f32 %v2901_v14, %v1815_v29  ;;  %v3035_v54 = vmax.f32 %v5472_v59, 0.0  ;;  %v5519_v27 = vadd.f32 %v4124_v32, %v5436_v18 }
 0x20f   : > { %v3040_v23 = vmax.f32 %v5475_v0, 0.0  ;;  %v5522_v62 = vadd.f32 %v4125_v26, %v5436_v18 }
 0x211   : > { %v3049_v33 = vmax.f32 %v5522_v62, 0.0 }
 0x212   : > { %v4087_v57 = vpop.f32.mrb[20].mxu0 }
 0x213   : > { %v5477_v29 = vpop.f32.mrb[28].mxu1  ;;  %v4127_v22 = vadd.f32 %v4087_v57, %v3951_v4  ;;  %v2914_v50 = vpop.f32.mrb[21].mxu0  ;;  %v5511_v4 = vadd.f32 %v4121_v25, %v5436_v18  ;;  %v3044_v25 = vmax.f32 %v5497_v13, 0.0  ;;  %v3046_v57 = vmax.f32 %v5519_v27, 0.0 }
 0x214   : > { %v5486_v21 = vpop.f32.mrb[29].mxu1  ;;  %v4128_v19 = vadd.f32 %v2914_v50, %v2056_v30  ;;  %v4088_v53 = vpop.f32.mrb[22].mxu0  ;;  %v5516_v30 = vadd.f32 %v4123_v37, %v5436_v18 }
 0x215   : > { %v5493_v20 = vpop.f32.mrb[30].mxu1  ;;  %v4129_v52 = vadd.f32 %v4088_v53, %v3952_v48  ;;  %v2917_v3 = vpop.f32.mrb[23].mxu0  ;;  %v3067_v48 = vld [vmem:[%s5830_s4 + $0x1] sm:$0x1]  ;;  %v5531_v43 = vadd.f32 %v4127_v22, %v5436_v18  ;;  %v3045_v14 = vmax.f32 %v5511_v4, 0.0 }
 0x216   : > { %v5502_v24 = vpop.f32.mrb[31].mxu1  ;;  %v4130_v61 = vadd.f32 %v2917_v3, %v2059_v34  ;;  %v3015_v34 = vadd.f32 %v4126_v41, %v5436_v18  ;;  %v5534_v7 = vadd.f32 %v4128_v19, %v5436_v18  ;;  %v3043_v41 = vmax.f32 %v3011_v40, 0.0 }
 0x217   : > { %v5537_v37 = vadd.f32 %v4129_v52, %v5436_v18  ;;  %v3048_v5 = vmax.f32 %v5516_v30, 0.0  ;;  %v3052_v19 = vmax.f32 %v5531_v43, 0.0 }
 0x218   : > { %v5540_v12 = vadd.f32 %v4130_v61, %v5436_v18  ;;  %v3047_v22 = vmax.f32 %v3015_v34, 0.0  ;;  %v3050_v53 = vmax.f32 %v5534_v7, 0.0 }
 0x219   : > { %v3053_v46 = vmax.f32 %v5537_v37, 0.0 }
 0x21a   : > { %v4091_v10 = vpop.f32.mrb[24].mxu0 }
 0x21b   : > { %v5543_v32 = vadd.f32 %v4091_v10, %v5438_v16  ;;  %v3118_v47 = vpop.f32.mrb[32].mxu1  ;;  %v2930_v26 = vpop.f32.mrb[25].mxu0 }
 0x21c   : > { %v3119_v55 = vadd.f32 %v3118_v47, %v3067_v48  ;;  %v4132_v8 = vadd.f32 %v2930_v26, %v5440_v11  ;;  %v4103_v9 = vpop.f32.mrb[33].mxu1  ;;  %v4092_v36 = vpop.f32.mrb[26].mxu0 }
 0x21d   : > { %v5552_v16 = vadd.f32 %v4092_v36, %v5442_v60  ;;  %v3121_v59 = vpop.f32.mrb[34].mxu1  ;;  %v2933_v0 = vpop.f32.mrb[27].mxu0  ;;  %v3051_v60 = vmax.f32 %v5540_v12, 0.0 }
 0x21e   : > { %v5554_v50 = vrot.slane %v3119_v55, %v3126_v35  ;;  %v3022_v58 = vadd.f32 %v4132_v8, %v5436_v18  ;;  %v5558_v11 = vadd.f32 %v2933_v0, %v5447_v45  ;;  %v4104_v56 = vpop.f32.mrb[35].mxu1 }
 0x21f   : > { %v3025_v26 = vadd.f32 %v5552_v16, %v5436_v18 }
 0x220   : > { %v3054_v35 = vmax.f32 %v3022_v58, 0.0  ;;  %v3128_v45 = vadd.f32 %v5554_v50, %v3030_v44  ;;  %v3129_v52 = vadd.f32 %v5554_v50, %v3031_v63  ;;  %v3130_v3 = vadd.f32 %v5554_v50, %v3032_v39 }
 0x221   : > { %v3131_v13 = vadd.f32 %v5554_v50, %v3033_v31  ;;  %v5578_v17 = vadd.f32 %v5554_v50, %v3034_v51  ;;  %v5581_v61 = vadd.f32 %v5554_v50, %v3035_v54  ;;  %v5584_v49 = vadd.f32 %v5554_v50, %v3036_v38 }
 0x222   : > { %v5587_v44 = vadd.f32 %v5554_v50, %v3037_v2  ;;  %v5590_v28 = vadd.f32 %v5554_v50, %v3038_v42  ;;  %v5593_v39 = vadd.f32 %v5554_v50, %v3039_v15  ;;  %v5596_v31 = vadd.f32 %v5554_v50, %v3040_v23  ;;  %3160 = vst [vmem:[%s5567_s15] sm:$0xff] %v3128_v45  ;;  %v4095_v63 = vpop.f32.mrb[28].mxu0 }
 0x223   : > { %3161 = vst [vmem:[%s5567_s15 + $0x8] sm:$0xff] %v3129_v52  ;;  %3162 = vst [vmem:[%s5567_s15 + $0x10] sm:$0xff] %v3130_v3  ;;  %v5602_v38 = vadd.f32 %v5554_v50, %v3041_v6  ;;  %v5605_v51 = vadd.f32 %v5554_v50, %v3042_v1  ;;  %v5608_v2 = vadd.f32 %v5554_v50, %v3043_v41  ;;  %v2946_v23 = vpop.f32.mrb[29].mxu0  ;;  %v3057_v36 = vmax.f32 %v3025_v26, 0.0 }
 0x224   : > { %v5611_v54 = vadd.f32 %v5554_v50, %v3044_v25  ;;  %3163 = vst [vmem:[%s5567_s15 + $0x18] sm:$0xff] %v3131_v13  ;;  %3164 = vst [vmem:[%s5567_s15 + $0x20] sm:$0xff] %v5578_v17  ;;  %v5621_v42 = vadd.f32 %v5554_v50, %v3045_v14  ;;  %v5624_v6 = vadd.f32 %v5554_v50, %v3046_v57  ;;  %v4096_v15 = vpop.f32.mrb[30].mxu0 }
 0x225   : > { %3165 = vst [vmem:[%s5567_s15 + $0x28] sm:$0xff] %v5581_v61  ;;  %3166 = vst [vmem:[%s5567_s15 + $0x30] sm:$0xff] %v5584_v49  ;;  %v5627_v4 = vadd.f32 %v5554_v50, %v3047_v22  ;;  %v5630_v40 = vadd.f32 %v5554_v50, %v3048_v5  ;;  %v5641_v30 = vadd.f32 %v5554_v50, %v3049_v33  ;;  %v2949_v25 = vpop.f32.mrb[31].mxu0 }
 0x226   : > { %3167 = vst [vmem:[%s5567_s15 + $0x38] sm:$0xff] %v5587_v44  ;;  %3168 = vst [vmem:[%s5567_s15 + $0x40] sm:$0xff] %v5590_v28  ;;  %v5644_v27 = vadd.f32 %v5554_v50, %v3050_v53  ;;  %v5647_v62 = vadd.f32 %v5554_v50, %v3051_v60  ;;  %v5650_v48 = vadd.f32 %v5554_v50, %v3052_v19 }
 0x227   : > { %3169 = vst [vmem:[%s5567_s15 + $0x48] sm:$0xff] %v5593_v39  ;;  %3170 = vst [vmem:[%s5567_s15 + $0x50] sm:$0xff] %v5596_v31  ;;  %v3024_v1 = vadd.f32 %v5543_v32, %v5436_v18  ;;  %v5663_v34 = vadd.f32 %v5554_v50, %v3053_v46  ;;  %v5666_v43 = vadd.f32 %v5554_v50, %v3054_v35 }
 0x228   : > { %3171 = vst [vmem:[%s5567_s15 + $0x58] sm:$0xff] %v5602_v38  ;;  %3172 = vst [vmem:[%s5567_s15 + $0x60] sm:$0xff] %v5605_v51  ;;  %v3192_v10 = vadd.f32 %v3129_v52, %v3128_v45  ;;  %v3230_v37 = vmul.f32 %v3128_v45, %v3128_v45  ;;  %v3231_v12 = vmul.f32 %v3129_v52, %v3129_v52 }
 0x229   : > { %3173 = vst [vmem:[%s5567_s15 + $0x68] sm:$0xff] %v5608_v2  ;;  %3174 = vst [vmem:[%s5567_s15 + $0x70] sm:$0xff] %v5611_v54  ;;  %v3056_v32 = vmax.f32 %v3024_v1, 0.0  ;;  %v3232_v41 = vmul.f32 %v3130_v3, %v3130_v3  ;;  %v3233_v55 = vmul.f32 %v3131_v13, %v3131_v13  ;;  %v3023_v5 = vadd.f32 %v5558_v11, %v5436_v18 }
 0x22a   : > { %3175 = vst [vmem:[%s5567_s15 + $0x78] sm:$0xff] %v5621_v42  ;;  %3176 = vst [vmem:[%s5567_s15 + $0x80] sm:$0xff] %v5624_v6  ;;  %v3193_v7 = vadd.f32 %v3192_v10, %v3130_v3  ;;  %v3262_v8 = vadd.f32 %v3231_v12, %v3230_v37  ;;  %v4135_v59 = vadd.f32 %v4095_v63, %v5477_v29 }
 0x22b   : > { %3177 = vst [vmem:[%s5567_s15 + $0x88] sm:$0xff] %v5627_v4  ;;  %3178 = vst [vmem:[%s5567_s15 + $0x90] sm:$0xff] %v5630_v40  ;;  %v5695_v57 = vadd.f32 %v5554_v50, %v3056_v32  ;;  %v4136_v16 = vadd.f32 %v2946_v23, %v5486_v21  ;;  %v4137_v0 = vadd.f32 %v4096_v15, %v5493_v20  ;;  %v3055_v11 = vmax.f32 %v3023_v5, 0.0 }
 0x22c   : > { %3179 = vst [vmem:[%s5567_s15 + $0x98] sm:$0xff] %v5641_v30  ;;  %3180 = vst [vmem:[%s5567_s15 + $0xa0] sm:$0xff] %v5644_v27  ;;  %v3194_v47 = vadd.f32 %v3193_v7, %v3131_v13  ;;  %v3263_v33 = vadd.f32 %v3262_v8, %v3232_v41  ;;  %v3234_v58 = vmul.f32 %v5578_v17, %v5578_v17 }
 0x22d   : > { %3181 = vst [vmem:[%s5567_s15 + $0xa8] sm:$0xff] %v5647_v62  ;;  %3182 = vst [vmem:[%s5567_s15 + $0xb0] sm:$0xff] %v5650_v48  ;;  %v5704_v56 = vadd.f32 %v5554_v50, %v3057_v36  ;;  %v3028_v53 = vadd.f32 %v4135_v59, %v5436_v18  ;;  %v3026_v29 = vadd.f32 %v4136_v16, %v5436_v18 }
 0x22e   : > { %3183 = vst [vmem:[%s5567_s15 + $0xb8] sm:$0xff] %v5663_v34  ;;  %3184 = vst [vmem:[%s5567_s15 + $0xc0] sm:$0xff] %v5666_v43  ;;  %v3195_v14 = vadd.f32 %v3194_v47, %v5578_v17  ;;  %v3264_v19 = vadd.f32 %v3263_v33, %v3233_v55  ;;  %v3029_v21 = vadd.f32 %v4137_v0, %v5436_v18 }
 0x22f   : > { %3186 = vst [vmem:[%s5567_s15 + $0xd0] sm:$0xff] %v5695_v57  ;;  %v3235_v46 = vmul.f32 %v5581_v61, %v5581_v61  ;;  %3187 = vst [vmem:[%s5567_s15 + $0xd8] sm:$0xff] %v5704_v56  ;;  %v5717_v60 = vadd.f32 %v5554_v50, %v3055_v11  ;;  %v4138_v35 = vadd.f32 %v2949_v25, %v5502_v24  ;;  %v3060_v52 = vmax.f32 %v3028_v53, 0.0 }
 0x230   : > { %v3196_v9 = vadd.f32 %v3195_v14, %v5581_v61  ;;  %v3265_v45 = vadd.f32 %v3264_v19, %v3234_v58  ;;  %v3058_v3 = vmax.f32 %v3026_v29, 0.0  ;;  %v3061_v13 = vmax.f32 %v3029_v21, 0.0 }
 0x231   : > { %v3236_v63 = vmul.f32 %v5584_v49, %v5584_v49  ;;  %3185 = vst [vmem:[%s5567_s15 + $0xc8] sm:$0xff] %v5717_v60  ;;  %v3027_v61 = vadd.f32 %v4138_v35, %v5436_v18  ;;  %v5727_v24 = vadd.f32 %v5554_v50, %v3060_v52  ;;  %v3238_v12 = vmul.f32 %v5590_v28, %v5590_v28 }
 0x232   : > { %v3197_v22 = vadd.f32 %v3196_v9, %v5584_v49  ;;  %v3266_v23 = vadd.f32 %v3265_v45, %v3235_v46  ;;  %v5730_v15 = vadd.f32 %v5554_v50, %v3058_v3  ;;  %v5733_v25 = vadd.f32 %v5554_v50, %v3061_v13 }
 0x233   : > { %v3059_v10 = vmax.f32 %v3027_v61, 0.0  ;;  %v3237_v49 = vmul.f32 %v5587_v44, %v5587_v44  ;;  %3190 = vst [vmem:[%s5567_s15 + $0xf0] sm:$0xff] %v5727_v24  ;;  %v3240_v41 = vmul.f32 %v5596_v31, %v5596_v31  ;;  %v3242_v36 = vmul.f32 %v5605_v51, %v5605_v51 }
 0x234   : > { %v3198_v20 = vadd.f32 %v3197_v22, %v5587_v44  ;;  %v3267_v7 = vadd.f32 %v3266_v23, %v3236_v63  ;;  %3188 = vst [vmem:[%s5567_s15 + $0xe0] sm:$0xff] %v5730_v15  ;;  %3191 = vst [vmem:[%s5567_s15 + $0xf8] sm:$0xff] %v5733_v25  ;;  %v3239_v44 = vmul.f32 %v5593_v39, %v5593_v39 }
 0x235   : > { %v5746_v37 = vadd.f32 %v5554_v50, %v3059_v10  ;;  %v3243_v33 = vmul.f32 %v5608_v2, %v5608_v2  ;;  %v3244_v16 = vmul.f32 %v5611_v54, %v5611_v54  ;;  %v3245_v22 = vmul.f32 %v5621_v42, %v5621_v42 }
 0x236   : > { %v3199_v17 = vadd.f32 %v3198_v20, %v5590_v28  ;;  %v3268_v32 = vadd.f32 %v3267_v7, %v3237_v49  ;;  %v3241_v28 = vmul.f32 %v5602_v38, %v5602_v38  ;;  %v3246_v11 = vmul.f32 %v5624_v6, %v5624_v6 }
 0x237   : > { %3189 = vst [vmem:[%s5567_s15 + $0xe8] sm:$0xff] %v5746_v37  ;;  %v3247_v53 = vmul.f32 %v5627_v4, %v5627_v4  ;;  %v3248_v21 = vmul.f32 %v5630_v40, %v5630_v40  ;;  %v3249_v46 = vmul.f32 %v5641_v30, %v5641_v30  ;;  %v3250_v45 = vmul.f32 %v5644_v27, %v5644_v27 }
 0x238   : > { %v3200_v1 = vadd.f32 %v3199_v17, %v5593_v39  ;;  %v3269_v26 = vadd.f32 %v3268_v32, %v3238_v12  ;;  %v3251_v3 = vmul.f32 %v5647_v62, %v5647_v62  ;;  %v3252_v17 = vmul.f32 %v5650_v48, %v5650_v48 }
 0x239   : > { %v3253_v61 = vmul.f32 %v5663_v34, %v5663_v34  ;;  %v3255_v7 = vmul.f32 %v5717_v60, %v5717_v60  ;;  %v3257_v32 = vmul.f32 %v5704_v56, %v5704_v56 }
 0x23a   : > { %v3201_v18 = vadd.f32 %v3200_v1, %v5596_v31  ;;  %v3270_v55 = vadd.f32 %v3269_v26, %v3239_v44  ;;  %v3254_v1 = vmul.f32 %v5666_v43, %v5666_v43  ;;  %v3258_v44 = vmul.f32 %v5730_v15, %v5730_v15 }
 0x23c   : > { %v3202_v47 = vadd.f32 %v3201_v18, %v5602_v38  ;;  %v3271_v8 = vadd.f32 %v3270_v55, %v3240_v41  ;;  %v3256_v18 = vmul.f32 %v5695_v57, %v5695_v57  ;;  %v3260_v55 = vmul.f32 %v5727_v24, %v5727_v24 }
 0x23e   : > { %v3203_v14 = vadd.f32 %v3202_v47, %v5605_v51  ;;  %v3272_v5 = vadd.f32 %v3271_v8, %v3241_v28  ;;  %v3261_v28 = vmul.f32 %v5733_v25, %v5733_v25 }
 0x240   : > { %v3204_v50 = vadd.f32 %v3203_v14, %v5608_v2  ;;  %v3273_v59 = vadd.f32 %v3272_v5, %v3242_v36 }
 0x242   : > { %v3205_v9 = vadd.f32 %v3204_v50, %v5611_v54  ;;  %v3274_v0 = vadd.f32 %v3273_v59, %v3243_v33 }
 0x244   : > { %v3206_v39 = vadd.f32 %v3205_v9, %v5621_v42  ;;  %v3275_v58 = vadd.f32 %v3274_v0, %v3244_v16 }
 0x246   : > { %v3207_v31 = vadd.f32 %v3206_v39, %v5624_v6  ;;  %v3276_v19 = vadd.f32 %v3275_v58, %v3245_v22 }
 0x248   : > { %v3208_v38 = vadd.f32 %v3207_v31, %v5627_v4  ;;  %v3277_v29 = vadd.f32 %v3276_v19, %v3246_v11 }
 0x24a   : > { %v3209_v51 = vadd.f32 %v3208_v38, %v5630_v40  ;;  %v3278_v20 = vadd.f32 %v3277_v29, %v3247_v53 }
 0x24c   : > { %v3210_v2 = vadd.f32 %v3209_v51, %v5641_v30  ;;  %v3279_v35 = vadd.f32 %v3278_v20, %v3248_v21 }
 0x24e   : > { %v3211_v54 = vadd.f32 %v3210_v2, %v5644_v27  ;;  %v3280_v52 = vadd.f32 %v3279_v35, %v3249_v46 }
 0x250   : > { %v3212_v42 = vadd.f32 %v3211_v54, %v5647_v62  ;;  %v3281_v13 = vadd.f32 %v3280_v52, %v3250_v45 }
 0x252   : > { %v3213_v6 = vadd.f32 %v3212_v42, %v5650_v48  ;;  %v3282_v63 = vadd.f32 %v3281_v13, %v3251_v3 }
 0x254   : > { %v3214_v4 = vadd.f32 %v3213_v6, %v5663_v34  ;;  %v3283_v23 = vadd.f32 %v3282_v63, %v3252_v17 }
 0x256   : > { %v3215_v40 = vadd.f32 %v3214_v4, %v5666_v43  ;;  %v3284_v10 = vadd.f32 %v3283_v23, %v3253_v61 }
 0x258   : > { %v3216_v30 = vadd.f32 %v3215_v40, %v5717_v60  ;;  %v3285_v49 = vadd.f32 %v3284_v10, %v3254_v1 }
 0x25a   : > { %v3217_v27 = vadd.f32 %v3216_v30, %v5695_v57  ;;  %v3286_v12 = vadd.f32 %v3285_v49, %v3255_v7  ;;  %v3259_v57 = vmul.f32 %v5746_v37, %v5746_v37 }
 0x25c   : > { %v3218_v62 = vadd.f32 %v3217_v27, %v5704_v56  ;;  %v3287_v43 = vadd.f32 %v3286_v12, %v3256_v18 }
 0x25e   : > { %v3219_v48 = vadd.f32 %v3218_v62, %v5730_v15  ;;  %v3288_v26 = vadd.f32 %v3287_v43, %v3257_v32 }
 0x260   : > { %v3220_v34 = vadd.f32 %v3219_v48, %v5746_v37  ;;  %v3289_v14 = vadd.f32 %v3288_v26, %v3258_v44 }
 0x262   : > { %v3221_v47 = vadd.f32 %v3220_v34, %v5727_v24  ;;  %v3290_v50 = vadd.f32 %v3289_v14, %v3259_v57 }
 0x264   : > { %v3222_v60 = vadd.f32 %v3221_v47, %v5733_v25  ;;  %v3291_v8 = vadd.f32 %v3290_v50, %v3260_v55 }
 0x266   : > { %v3223_v41 = vrot.slane %v3222_v60, 4  ;;  %v3292_v36 = vadd.f32 %v3291_v8, %v3261_v28 }
 0x268   : > { %v3224_v56 = vadd.f32 %v3223_v41, %v3222_v60  ;;  %v3293_v5 = vrot.slane %v3292_v36, 4 }
 0x26a   : > { %v3225_v9 = vrot.slane %v3224_v56, 2  ;;  %v3294_v37 = vadd.f32 %v3293_v5, %v3292_v36 }
 0x26c   : > { %v3226_v15 = vadd.f32 %v3225_v9, %v3224_v56  ;;  %v3295_v59 = vrot.slane %v3294_v37, 2 }
 0x26e   : > { %v3227_v39 = vrot.slane %v3226_v15, 1  ;;  %v3296_v24 = vadd.f32 %v3295_v59, %v3294_v37 }
 0x270   : > { %v3228_v33 = vadd.f32 %v3227_v39, %v3226_v15  ;;  %v3297_v31 = vrot.slane %v3296_v24, 1 }
 0x272   : > { %3229 = vst [vmem:[%s276_s19] sm:$0x1] %v3228_v33  ;;  %v3298_v16 = vadd.f32 %v3297_v31, %v3296_v24 }
 0x274   : > { %3299 = vst [vmem:[%s276_s19 + $0x1] sm:$0x1] %v3298_v16 }
 0x275 PF: > { %s17_s21 = sadd.s32 1, %s4414_s21  }
 0x276   : > { %p14_p4 = scmp.ge.s32.totalorder %s17_s21, 4  }
 0x278   :  { %16 = sbr.rel (!%p14_p4) target bundleno = 1 (0x1), region = 93 }

</bundles_post_ra>
